<compile_context>
chip_gen: v5e
topology: v5e:2x2
jax: 0.10.0
libtpu: 0.0.40
codegen_flags: <defaults>
</compile_context>

<pallas_src>
import jax
import jax.numpy as jnp
from jax.experimental import pallas as pl
from jax.experimental.pallas import tpu as pltpu

N_BITS = 8  # activation quantizer bit-width
_QMAX = float(2 ** N_BITS - 1)


def _round_up(x, m):
    return (x + m - 1) // m * m


def _default_vmem_limit():
    """Pick a VMEM budget with headroom below the chip's physical capacity."""
    try:
        cap = int(pltpu.get_tpu_info().vmem_capacity_bytes)
    except Exception:
        return 48 << 20  # safe for every generation (incl. v7x 64 MiB)
    return min(96 << 20, max(32 << 20, (cap * 3) // 4))


def _select_tiles(M, K, N, vmem_budget):
    """Choose (tm, tn, M_pad): lane-dense tn, largest tm that fits VMEM and
    does not waste >~25% of rows on padding."""
    tn = 128
    for c in (512, 256, 128):
        if N % c == 0:
            tn = c
            break

    M8 = _round_up(max(M, 8), 8)
    budget = vmem_budget - (vmem_budget // 8)  # headroom for compiler scratch
    tm = 8
    for c in (256, 128, 64, 32, 16, 8):
        ws = (2 * c * K * 4        # x row block, double-buffered f32
              + 2 * K * tn * 2     # weight tile, double-buffered bf16
              + 2 * c * tn * 4     # output tile, double-buffered (<= f32)
              + c * K * 2          # bf16 (q - zp) scratch cache
              + 2 * c * K * 4)     # live f32 elementwise temporaries (quant phase)
        if ws <= budget:
            tm = c
            break
    tm = min(tm, M8)
    # shrink the row tile if it would waste >25% of rows to padding
    while tm > 8 and _round_up(M8, tm) > M8 + max(M8 // 4, 8):
        tm //= 2
    tm = max(8, _round_up(tm, 8))
    return tm, tn, _round_up(M8, tm)


def quant_linear_kernel(x_ref, wt_ref, b_ref, o_ref, xq_ref, coef_ref, ratio_ref):
    # x_ref:     (tm, K) f32     activation row block (fetched once per i)
    # wt_ref:    (K, tn) bf16    pre-transposed weight tile (MXU-native RHS)
    # b_ref:     (1, tn) f32     bias tile
    # o_ref:     (tm, tn)        output tile, written in final dtype
    # xq_ref:    (tm, K) bf16    scratch: cached integer-valued (q - zp)
    # coef_ref:  (tm, 1) f32     scratch: per-row scale * ratio
    # ratio_ref: (tm, 1) f32     scratch: per-row ratio (multiplies the bias)

    # ---- per-row quantization: computed ONCE per row block (j == 0) ----
    @pl.when(pl.program_id(1) == 0)
    def _quantize():
        x = x_ref[...]
        # xlen = torch.norm(input, p=2, dim=-1, keepdim=True)
        xlen = jnp.sqrt(jnp.sum(x * x, axis=-1, keepdims=True))
        # per-token asymmetric min-max uniform-affine fake quant
        xmax = jnp.max(x, axis=-1, keepdims=True)
        xmin = jnp.min(x, axis=-1, keepdims=True)
        scale = jnp.maximum((xmax - xmin) / _QMAX, 1e-8)
        inv_scale = pl.reciprocal(scale, approx=False)  # one recip/row, bcast mul
        zp = jnp.round(-xmin * inv_scale)
        # integer-valued (q - zp) in [-255, 255]: exact in bf16, so the MXU
        # matmul introduces no activation rounding error.
        q = jnp.clip(jnp.round(x * inv_scale) + zp, 0.0, _QMAX) - zp
        xq_ref[...] = q.astype(jnp.bfloat16)
        # xqlen = ||x_dq|| = scale * ||q - zp||   (x_dq never materialized)
        xqlen = scale * jnp.sqrt(jnp.sum(q * q, axis=-1, keepdims=True))
        # out /= (xqlen / xlen).  NOTE: all-zero rows (only padding rows here)
        # get ratio = 1 instead of the 0/0 NaN the PyTorch module produces.
        ratio = jnp.where(xqlen > 0.0,
                          xlen * pl.reciprocal(xqlen, approx=False),
                          1.0)
        coef_ref[...] = scale * ratio
        ratio_ref[...] = ratio

    # ---- MXU matmul on cached integer activations + fused epilogue ----
    acc = jnp.dot(xq_ref[...], wt_ref[...], preferred_element_type=jnp.float32)
    o_ref[...] = (acc * coef_ref[...] + b_ref[...] * ratio_ref[...]).astype(o_ref.dtype)


def prepare_quant_linear_params(weight, bias):
    """Call ONCE at parameter-load time (not per forward).

    weight: (out_features, in_features) as nn.Linear stores it.
    Returns (w_t, b2): MXU-native (in, out) bf16 weight and (1, out) f32 bias.
    """
    N, K = weight.shape
    w_t = jnp.asarray(weight, jnp.float32).T.astype(jnp.bfloat16)
    if bias is None:
        b2 = jnp.zeros((1, N), jnp.float32)
    else:
        b2 = jnp.asarray(bias, jnp.float32).reshape(1, N)
    return w_t, b2


def quant_linear(x, w_t, b2, *, vmem_limit_bytes=None):
    """x: (..., in_features); w_t/b2 from prepare_quant_linear_params."""
    K, N = w_t.shape
    assert K % 128 == 0, "in_features must be a multiple of 128"
    assert N % 128 == 0, "out_features must be a multiple of 128"

    orig_lead = x.shape[:-1]
    out_dtype = x.dtype
    x2 = x.reshape(-1, K).astype(jnp.float32)
    M = x2.shape[0]

    if vmem_limit_bytes is None:
        vmem_limit_bytes = _default_vmem_limit()
    tm, tn, M_pad = _select_tiles(M, K, N, vmem_limit_bytes)

    if M_pad != M:
        x2 = jnp.pad(x2, ((0, M_pad - M), (0, 0)))

    out = pl.pallas_call(
        quant_linear_kernel,
        out_shape=jax.ShapeDtypeStruct((M_pad, N), out_dtype),
        grid_spec=pltpu.PrefetchScalarGridSpec(
            num_scalar_prefetch=0,
            grid=(M_pad // tm, N // tn),
            in_specs=[
                pl.BlockSpec((tm, K), lambda i, j: (i, 0)),   # activation rows (per i)
                pl.BlockSpec((K, tn), lambda i, j: (0, j)),   # pre-transposed weight
                pl.BlockSpec((1, tn), lambda i, j: (0, j)),   # bias tile (tiny DMA)
            ],
            out_specs=pl.BlockSpec((tm, tn), lambda i, j: (i, j)),
            scratch_shapes=[
                pltpu.VMEM((tm, K), jnp.bfloat16),   # cached (q - zp)
                pltpu.VMEM((tm, 1), jnp.float32),    # scale * ratio
                pltpu.VMEM((tm, 1), jnp.float32),    # ratio
            ],
        ),
        compiler_params=pltpu.CompilerParams(
            # M axis sharded across TensorCores (megacore); N axis must stay
            # sequential so the scratch cache written at j == 0 is valid j > 0.
            dimension_semantics=("parallel", "arbitrary"),
            vmem_limit_bytes=vmem_limit_bytes,
        ),
    )(x2, w_t, b2)

    if M_pad != M:
        out = out[:M]
    return out.reshape(*orig_lead, N)


def quant_linear_ref(x, weight, bias):
    """Pure-JAX reference of the same forward path (bf16 weight, f32 activations)."""
    x = x.astype(jnp.float32)
    xlen = jnp.sqrt(jnp.sum(x * x, axis=-1, keepdims=True))
    xmax = jnp.max(x, axis=-1, keepdims=True)
    xmin = jnp.min(x, axis=-1, keepdims=True)
    scale = jnp.maximum((xmax - xmin) / _QMAX, 1e-8)
    inv_scale = 1.0 / scale
    zp = jnp.round(-xmin * inv_scale)
    q = jnp.clip(jnp.round(x * inv_scale) + zp, 0.0, _QMAX) - zp
    x_dq = q * scale
    xqlen = jnp.sqrt(jnp.sum(x_dq * x_dq, axis=-1, keepdims=True))
    w_bf16 = weight.astype(jnp.float32).astype(jnp.bfloat16).astype(jnp.float32)
    out = jnp.dot(x_dq, w_bf16.T) + bias.astype(jnp.float32)
    ratio = jnp.where(xqlen > 0.0, xlen / xqlen, 1.0)
    return (out * ratio).astype(x.dtype)


if __name__ == "__main__":
    batch, seq, in_features, out_features = 2, 8, 512, 512

    key = jax.random.PRNGKey(0)
    kx, kw, kb = jax.random.split(key, 3)
    x = jax.random.normal(kx, (batch, seq, in_features), dtype=jnp.float32)
    weight = 0.02 * jax.random.normal(kw, (out_features, in_features), dtype=jnp.float32)
    bias = 0.01 * jax.random.normal(kb, (out_features,), dtype=jnp.float32)

    # Weight transpose / bf16 cast hoisted out of the per-call path.
    w_t, b2 = prepare_quant_linear_params(weight, bias)

    out = quant_linear(x, w_t, b2)
    out = jax.block_until_ready(out)

    ref = quant_linear_ref(x, weight, bias)
    assert out.shape == (batch, seq, out_features)
    assert out.dtype == x.dtype
    assert jnp.allclose(out, ref, rtol=5e-3, atol=5e-3), "mismatch vs reference"

    print("KERNEL_OK")
</pallas_src>

<mosaic_0001>
module attributes {stable_mosaic.version = 11 : i64} {
  func.func @quant_linear_kernel(%arg0: i32, %arg1: i32, %arg2: memref<16x512xf32, #tpu.memory_space<vmem>>, %arg3: memref<512x512xbf16, #tpu.memory_space<vmem>>, %arg4: memref<1x512xf32, #tpu.memory_space<vmem>>, %arg5: memref<16x512xf32, #tpu.memory_space<vmem>>, %arg6: memref<16x512xbf16, #tpu.memory_space<vmem>>, %arg7: memref<16x1xf32, #tpu.memory_space<vmem>>, %arg8: memref<16x1xf32, #tpu.memory_space<vmem>>) attributes {dimension_semantics = [#tpu.dimension_semantics<parallel>, #tpu.dimension_semantics<arbitrary>], iteration_bounds = array<i64: 1, 1>, scalar_prefetch = 0 : i64, scratch_operands = 3 : i64, tpu.core_type = #tpu.core_type<tc>, window_params = [{transform_indices = @transform_0, window_bounds = array<i64: 16, 512>}, {transform_indices = @transform_1, window_bounds = array<i64: 512, 512>}, {transform_indices = @transform_2, window_bounds = array<i64: 1, 512>}, {transform_indices = @transform_3, window_bounds = array<i64: 16, 512>}]} {
    %c0_i32 = arith.constant 0 : i32
    %0 = arith.cmpi eq, %arg1, %c0_i32 : i32
    %1 = arith.extui %0 : i1 to i32
    %c0_i32_0 = arith.constant 0 : i32
    %2 = arith.cmpi ne, %1, %c0_i32_0 : i32
    scf.if %2 {
      %c0_12 = arith.constant 0 : index
      %c0_13 = arith.constant 0 : index
      %16 = vector.load %arg2[%c0_12, %c0_13] : memref<16x512xf32, #tpu.memory_space<vmem>>, vector<16x512xf32>
      %17 = arith.mulf %16, %16 : vector<16x512xf32>
      %cst_14 = arith.constant dense<0.000000e+00> : vector<16xf32>
      %18 = vector.multi_reduction <add>, %17, %cst_14 [1] : vector<16x512xf32> to vector<16xf32>
      %19 = vector.shape_cast %18 : vector<16xf32> to vector<16x1xf32>
      %20 = math.sqrt %19 : vector<16x1xf32>
      %cst_15 = arith.constant dense<0xFF800000> : vector<16xf32>
      %21 = vector.multi_reduction <maximumf>, %16, %cst_15 [1] : vector<16x512xf32> to vector<16xf32>
      %22 = vector.shape_cast %21 : vector<16xf32> to vector<16x1xf32>
      %cst_16 = arith.constant dense<0x7F800000> : vector<16xf32>
      %23 = vector.multi_reduction <minimumf>, %16, %cst_16 [1] : vector<16x512xf32> to vector<16xf32>
      %24 = vector.shape_cast %23 : vector<16xf32> to vector<16x1xf32>
      %25 = arith.subf %22, %24 : vector<16x1xf32>
      %cst_17 = arith.constant 2.550000e+02 : f32
      %26 = vector.broadcast %cst_17 : f32 to vector<16x1xf32>
      %27 = arith.divf %25, %26 : vector<16x1xf32>
      %cst_18 = arith.constant 9.99999993E-9 : f32
      %28 = vector.broadcast %cst_18 : f32 to vector<16x1xf32>
      %29 = arith.maximumf %27, %28 : vector<16x1xf32>
      %30 = tpu.reciprocal %29 : vector<16x1xf32> -> vector<16x1xf32>
      %cst_19 = arith.constant 0.000000e+00 : f32
      %31 = vector.broadcast %cst_19 : f32 to vector<16x1xf32>
      %32 = arith.subf %31, %24 : vector<16x1xf32>
      %33 = arith.mulf %32, %30 : vector<16x1xf32>
      %34 = math.roundeven %33 : vector<16x1xf32>
      %35 = vector.broadcast %30 : vector<16x1xf32> to vector<16x512xf32>
      %36 = arith.mulf %16, %35 : vector<16x512xf32>
      %37 = math.roundeven %36 : vector<16x512xf32>
      %38 = vector.broadcast %34 : vector<16x1xf32> to vector<16x512xf32>
      %39 = arith.addf %37, %38 : vector<16x512xf32>
      %cst_20 = arith.constant 0.000000e+00 : f32
      %cst_21 = arith.constant 2.550000e+02 : f32
      %40 = vector.broadcast %cst_20 : f32 to vector<16x512xf32>
      %41 = arith.maximumf %40, %39 : vector<16x512xf32>
      %42 = vector.broadcast %cst_21 : f32 to vector<16x512xf32>
      %43 = arith.minimumf %42, %41 : vector<16x512xf32>
      %44 = vector.broadcast %34 : vector<16x1xf32> to vector<16x512xf32>
      %45 = arith.subf %43, %44 : vector<16x512xf32>
      %46 = arith.truncf %45 : vector<16x512xf32> to vector<16x512xbf16>
      %c0_22 = arith.constant 0 : index
      %c0_23 = arith.constant 0 : index
      %47 = vector.load %arg6[%c0_22, %c0_23] : memref<16x512xbf16, #tpu.memory_space<vmem>>, vector<16x512xbf16>
      tpu.vector_store %arg6[%c0_22, %c0_23], %46 {strides = array<i32>} : memref<16x512xbf16, #tpu.memory_space<vmem>>, vector<16x512xbf16>,
      %48 = arith.mulf %45, %45 : vector<16x512xf32>
      %cst_24 = arith.constant dense<0.000000e+00> : vector<16xf32>
      %49 = vector.multi_reduction <add>, %48, %cst_24 [1] : vector<16x512xf32> to vector<16xf32>
      %50 = vector.shape_cast %49 : vector<16xf32> to vector<16x1xf32>
      %51 = math.sqrt %50 : vector<16x1xf32>
      %52 = arith.mulf %29, %51 : vector<16x1xf32>
      %cst_25 = arith.constant 0.000000e+00 : f32
      %53 = vector.broadcast %cst_25 : f32 to vector<16x1xf32>
      %54 = arith.cmpf ogt, %52, %53 : vector<16x1xf32>
      %55 = tpu.reciprocal %52 : vector<16x1xf32> -> vector<16x1xf32>
      %56 = arith.mulf %20, %55 : vector<16x1xf32>
      %cst_26 = arith.constant 1.000000e+00 : f32
      %57 = vector.broadcast %cst_26 : f32 to vector<16x1xf32>
      %58 = arith.select %54, %56, %57 : vector<16x1xi1>, vector<16x1xf32>
      %59 = arith.mulf %29, %58 : vector<16x1xf32>
      %c0_27 = arith.constant 0 : index
      %c0_28 = arith.constant 0 : index
      %60 = vector.load %arg7[%c0_27, %c0_28] : memref<16x1xf32, #tpu.memory_space<vmem>>, vector<16x1xf32>
      tpu.vector_store %arg7[%c0_27, %c0_28], %59 {strides = array<i32>} : memref<16x1xf32, #tpu.memory_space<vmem>>, vector<16x1xf32>,
      %c0_29 = arith.constant 0 : index
      %c0_30 = arith.constant 0 : index
      %61 = vector.load %arg8[%c0_29, %c0_30] : memref<16x1xf32, #tpu.memory_space<vmem>>, vector<16x1xf32>
      tpu.vector_store %arg8[%c0_29, %c0_30], %58 {strides = array<i32>} : memref<16x1xf32, #tpu.memory_space<vmem>>, vector<16x1xf32>,
    } else {
    }
    %c0 = arith.constant 0 : index
    %c0_1 = arith.constant 0 : index
    %3 = vector.load %arg6[%c0, %c0_1] : memref<16x512xbf16, #tpu.memory_space<vmem>>, vector<16x512xbf16>
    %c0_2 = arith.constant 0 : index
    %c0_3 = arith.constant 0 : index
    %4 = vector.load %arg3[%c0_2, %c0_3] : memref<512x512xbf16, #tpu.memory_space<vmem>>, vector<512x512xbf16>
    %cst = arith.constant dense<0.000000e+00> : vector<16x512xf32>
    %5 = tpu.matmul %3, %4, %cst {dimension_numbers = #tpu.dot_dimension_numbers<[1], [0], [0], [1], [0, 0, 1, 1], [], []>} : vector<16x512xbf16>, vector<512x512xbf16>, vector<16x512xf32> -> vector<16x512xf32>
    %c0_4 = arith.constant 0 : index
    %c0_5 = arith.constant 0 : index
    %6 = vector.load %arg7[%c0_4, %c0_5] : memref<16x1xf32, #tpu.memory_space<vmem>>, vector<16x1xf32>
    %7 = vector.broadcast %6 : vector<16x1xf32> to vector<16x512xf32>
    %8 = arith.mulf %5, %7 : vector<16x512xf32>
    %c0_6 = arith.constant 0 : index
    %c0_7 = arith.constant 0 : index
    %9 = vector.load %arg4[%c0_6, %c0_7] : memref<1x512xf32, #tpu.memory_space<vmem>>, vector<1x512xf32>
    %c0_8 = arith.constant 0 : index
    %c0_9 = arith.constant 0 : index
    %10 = vector.load %arg8[%c0_8, %c0_9] : memref<16x1xf32, #tpu.memory_space<vmem>>, vector<16x1xf32>
    %11 = vector.broadcast %9 : vector<1x512xf32> to vector<16x512xf32>
    %12 = vector.broadcast %10 : vector<16x1xf32> to vector<16x512xf32>
    %13 = arith.mulf %11, %12 : vector<16x512xf32>
    %14 = arith.addf %8, %13 : vector<16x512xf32>
    %c0_10 = arith.constant 0 : index
    %c0_11 = arith.constant 0 : index
    %15 = vector.load %arg5[%c0_10, %c0_11] : memref<16x512xf32, #tpu.memory_space<vmem>>, vector<16x512xf32>
    tpu.vector_store %arg5[%c0_10, %c0_11], %14 {strides = array<i32>} : memref<16x512xf32, #tpu.memory_space<vmem>>, vector<16x512xf32>,
    return
  }
  func.func @transform_0(%arg0: i32, %arg1: i32) -> (i32, i32) {
    %c0_i32 = arith.constant 0 : i32
    %c0_i32_0 = arith.constant 0 : i32
    return %arg0, %c0_i32 : i32, i32
  }
  func.func @transform_1(%arg0: i32, %arg1: i32) -> (i32, i32) {
    %c0_i32 = arith.constant 0 : i32
    %c0_i32_0 = arith.constant 0 : i32
    return %c0_i32, %arg1 : i32, i32
  }
  func.func @transform_2(%arg0: i32, %arg1: i32) -> (i32, i32) {
    %c0_i32 = arith.constant 0 : i32
    %c0_i32_0 = arith.constant 0 : i32
    return %c0_i32, %arg1 : i32, i32
  }
  func.func @transform_3(%arg0: i32, %arg1: i32) -> (i32, i32) {
    %c0_i32 = arith.constant 0 : i32
    return %arg0, %arg1 : i32, i32
  }
}

</mosaic_0001>

<bundles_post_ra>
// kernel: tpu_custom_call.1
= control target key start
LH: loop header
LB: loop body
LE: loop exit
PB: predicated region body
PF: predicated region fallthrough
CT: control target
= control target key end

     0   :  { %8 = vsyncpa [#allocation6], 0  ;;  %s2619_s0 = inlined_call_operand.hbm [shape: f32[16,512], index: 0, kind: input, shape index: {}]   ;;  %s2620_s1 = inlined_call_operand.hbm [shape: bf16[512,512], index: 1, kind: input, shape index: {}]   ;;  %s2621_s2 = inlined_call_operand.hbm [shape: f32[1,512], index: 2, kind: input, shape index: {}]   ;;  %s2622_s3 = inlined_call_operand.hbm [shape: f32[16,512], index: 3, kind: output, shape index: {}]  }
   0x1   :  { %9 = vsyncpa [#allocation9], 0  ;;  %s28_s14 = sshll.u32 %s2620_s1, 4  ;;  %s29_s14 = int_to_ptr.hbm [resolvable:$true] %s28_s14 }
   0x2   :  { %10 = vsyncpa [#allocation7], 0  ;;  %s2297_s15 = smov [#allocation8]   ;;  %s15_s19 = sshll.u32 %s2619_s0, 4  ;;  %s16_s19 = int_to_ptr.hbm [resolvable:$true] %s15_s19 }
   0x3   :  { %s30_s16 = sshll.u32 %s2297_s15, 4  ;;  %s2298_s20 = smov 256   ;;  %s31_s16 = int_to_ptr.vmem [resolvable:$true] %s30_s16 }
   0x4   :  { %s2299_s21 = smov 16   ;;  %s2300_s22 = smov [#allocation5]  }
   0x5   :  { %36 = dma.hbm_to_vmem [thread:$0]  %s29_s14, 16384, %s31_s16, [#allocation9], %s2298_s20, %s2298_s20, %s2299_s21  }
   0x6   :  { %s17_s23 = sshll.u32 %s2300_s22, 4  ;;  %s2301_s24 = smov 512   ;;  %s18_s23 = int_to_ptr.vmem [resolvable:$true] %s17_s23 }
   0x7   :  { %s2302_s25 = smov 32   ;;  %s42_s27 = sshll.u32 %s2621_s2, 4  ;;  %s43_s27 = int_to_ptr.hbm [resolvable:$true] %s42_s27 }
   0x8   :  { %23 = dma.hbm_to_vmem [thread:$0]  %s16_s19, 1024, %s18_s23, [#allocation6], %s2301_s24, %s2301_s24, %s2302_s25  }
   0x9   :  { %s2303_s28 = smov [#allocation10]  }
   0xa   :  { %s44_s0 = sshll.u32 %s2303_s28, 4  ;;  %s45_s0 = int_to_ptr.vmem [resolvable:$true] %s44_s0 }
   0xb   :  { %47 = dma.hbm_to_vmem [thread:$0]  %s43_s27, 64, %s45_s0, [#allocation9]  }
   0xc   :  { %2291 = dma.done.wait [#allocation6], 1024  }
   0xd   :  { %2292 = vsyncadd [#allocation6], 4294966272 }
   0xe   :  { %2293 = dma.done.wait [#allocation9], 16448  }
   0xf   :  { %2294 = vsyncadd [#allocation9], 4294950848  ;;  %v2339_v0 = vld [vmem:[#allocation5] sm:$0xff]  ;;  %v2341_v1 = vld [vmem:[#allocation5 + $0x8] sm:$0xff]  ;;  %v2304_v35 = vmov 255.0   ;;  %s2306_s2 = smov [#allocation11]  }
  0x10   :  { %v2343_v2 = vld [vmem:[#allocation5 + $0x10] sm:$0xff]  ;;  %v2345_v3 = vld [vmem:[#allocation5 + $0x18] sm:$0xff]  ;;  %v2355_v8 = vld [vmem:[#allocation5 + $0x20] sm:$0xff]  ;;  %2177 = vrcp.f32 %v2304_v35  ;;  %s1408_s29 = sshll.u32 %s2306_s2, 4  ;;  %s1410_s5 = sshll.u32 %s2622_s3, 4  ;;  %s1409_s29 = int_to_ptr.vmem [resolvable:$true] %s1408_s29  ;;  %s1411_s5 = int_to_ptr.hbm [resolvable:$true] %s1410_s5 }
  0x11   :  { %v124_v4 = vmin.f32 %v2339_v0, %v2343_v2  ;;  %v114_v5 = vmax.f32 %v2339_v0, %v2343_v2  ;;  %v125_v6 = vmin.f32 %v2341_v1, %v2345_v3  ;;  %v115_v7 = vmax.f32 %v2341_v1, %v2345_v3  ;;  %v2357_v9 = vld [vmem:[#allocation5 + $0x30] sm:$0xff]  ;;  %v2359_v10 = vld [vmem:[#allocation5 + $0x28] sm:$0xff]  ;;  %v2361_v11 = vld [vmem:[#allocation5 + $0x38] sm:$0xff] }
  0x12   :  { %v129_v14 = vmin.f32 %v2355_v8, %v2357_v9  ;;  %v130_v15 = vmin.f32 %v2359_v10, %v2361_v11  ;;  %v119_v16 = vmax.f32 %v2355_v8, %v2357_v9  ;;  %v120_v17 = vmax.f32 %v2359_v10, %v2361_v11  ;;  %v1554_v20 = vld [vmem:[#allocation8 + $0xe0] sm:$0xf]  ;;  %v1986_v21 = vld [vmem:[#allocation8 + $0xec] sm:$0xf0] }
  0x13   :  { %v126_v12 = vmin.f32 %v124_v4, %v125_v6  ;;  %v116_v13 = vmax.f32 %v114_v5, %v115_v7  ;;  %v1682_v22 = vld [vmem:[#allocation8 + $0x1e0] sm:$0xf]  ;;  %v1555_v23 = vor.u32 %v1986_v21, %v1554_v20  ;;  %v2018_v24 = vld [vmem:[#allocation8 + $0x1ec] sm:$0xf0] }
  0x14   :  { %v131_v18 = vmin.f32 %v129_v14, %v130_v15  ;;  %v121_v19 = vmax.f32 %v119_v16, %v120_v17  ;;  %v1810_v25 = vld [vmem:[#allocation8 + $0x2e0] sm:$0xf]  ;;  %v2050_v26 = vld [vmem:[#allocation8 + $0x2ec] sm:$0xf0]  ;;  %v1683_v27 = vor.u32 %v2018_v24, %v1682_v22 }
  0x15   :  { %127 = vmin.xlane.f32.xlu1 %v126_v12  ;;  %117 = vmax.xlane.f32.xlu0 %v116_v13  ;;  %v1811_v28 = vor.u32 %v2050_v26, %v1810_v25  ;;  %v1938_v29 = vld [vmem:[#allocation8 + $0x3e0] sm:$0xf]  ;;  %v2082_v30 = vld [vmem:[#allocation8 + $0x3ec] sm:$0xf0] }
  0x16   :  { %1114 = vmatpush.bf16.msra.mxu0 %v1555_v23  ;;  %v1939_v31 = vor.u32 %v2082_v30, %v1938_v29  ;;  %1128 = vmatpush.bf16.msra.mxu1 %v1683_v27  ;;  %v1538_v32 = vld [vmem:[#allocation8 + $0xc0] sm:$0xf]  ;;  %v1982_v33 = vld [vmem:[#allocation8 + $0xcc] sm:$0xf0]  ;;  %v2371_v56 = vpop.eup %2177 }
  0x17   :  { %1142 = vmatpush.bf16.msra.mxu2 %v1811_v28  ;;  %v1666_v34 = vld [vmem:[#allocation8 + $0x1c0] sm:$0xf]  ;;  %v1539_v36 = vor.u32 %v1982_v33, %v1538_v32  ;;  %v2014_v37 = vld [vmem:[#allocation8 + $0x1cc] sm:$0xf0]  ;;  %v137_v5 = vmul.f32 255.0, %v2371_v56  ;;  %vm141_vm0 = vweird.f32 %v2371_v56 }
  0x18   :  { %1156 = vmatpush.bf16.msra.mxu3 %v1939_v31  ;;  %v1794_v38 = vld [vmem:[#allocation8 + $0x2c0] sm:$0xf]  ;;  %v2046_v39 = vld [vmem:[#allocation8 + $0x2cc] sm:$0xf0]  ;;  %v1667_v40 = vor.u32 %v2014_v37, %v1666_v34 }
  0x19   :  { %v1795_v41 = vor.u32 %v2046_v39, %v1794_v38  ;;  %v1922_v42 = vld [vmem:[#allocation8 + $0x3c0] sm:$0xf]  ;;  %v2078_v43 = vld [vmem:[#allocation8 + $0x3cc] sm:$0xf0]  ;;  %v138_v22 = vsub.f32 1.0, %v137_v5 }
  0x1a   :  { %1115 = vmatpush.bf16.msra.mxu0 %v1539_v36  ;;  %v1923_v44 = vor.u32 %v2078_v43, %v1922_v42  ;;  %1129 = vmatpush.bf16.msra.mxu1 %v1667_v40  ;;  %v1522_v45 = vld [vmem:[#allocation8 + $0xa0] sm:$0xf]  ;;  %v1978_v46 = vld [vmem:[#allocation8 + $0xac] sm:$0xf0] }
  0x1b   :  { %1143 = vmatpush.bf16.msra.mxu2 %v1795_v41  ;;  %v1650_v47 = vld [vmem:[#allocation8 + $0x1a0] sm:$0xf]  ;;  %v1523_v48 = vor.u32 %v1978_v46, %v1522_v45  ;;  %v2010_v49 = vld [vmem:[#allocation8 + $0x1ac] sm:$0xf0]  ;;  %v139_v35 = vmul.f32 %v2371_v56, %v138_v22  ;;  %v1812_v22 = vld [vmem:[#allocation8 + $0x2f0] sm:$0xf0] }
  0x1c   :  { %1157 = vmatpush.bf16.msra.mxu3 %v1923_v44  ;;  %v1778_v50 = vld [vmem:[#allocation8 + $0x2a0] sm:$0xf]  ;;  %v2042_v51 = vld [vmem:[#allocation8 + $0x2ac] sm:$0xf0]  ;;  %v1651_v52 = vor.u32 %v2010_v49, %v1650_v47 }
  0x1d   :  { %132 = vmin.xlane.f32.xlu1 %v131_v18  ;;  %122 = vmax.xlane.f32.xlu0 %v121_v19  ;;  %v1779_v53 = vor.u32 %v2042_v51, %v1778_v50  ;;  %v1906_v54 = vld [vmem:[#allocation8 + $0x3a0] sm:$0xf]  ;;  %v2074_v55 = vld [vmem:[#allocation8 + $0x3ac] sm:$0xf0] }
  0x1e   :  { %1116 = vmatpush.bf16.msra.mxu0 %v1523_v48  ;;  %v1907_v57 = vor.u32 %v2074_v55, %v1906_v54  ;;  %1130 = vmatpush.bf16.msra.mxu1 %v1651_v52  ;;  %v1506_v58 = vld [vmem:[#allocation8 + $0x80] sm:$0xf]  ;;  %v1974_v59 = vld [vmem:[#allocation8 + $0x8c] sm:$0xf0]  ;;  %v140_v48 = vadd.f32 %v2371_v56, %v139_v35  ;;  %v2076_v35 = vld [vmem:[#allocation8 + $0x3c4] sm:$0xf] }
  0x1f   :  { %1144 = vmatpush.bf16.msra.mxu2 %v1779_v53  ;;  %v1634_v60 = vld [vmem:[#allocation8 + $0x180] sm:$0xf]  ;;  %v1507_v61 = vor.u32 %v1974_v59, %v1506_v58  ;;  %v2006_v62 = vld [vmem:[#allocation8 + $0x18c] sm:$0xf0] }
  0x20   :  { %1158 = vmatpush.bf16.msra.mxu3 %v1907_v57  ;;  %v1762_v63 = vld [vmem:[#allocation8 + $0x280] sm:$0xf]  ;;  %v2038_v4 = vld [vmem:[#allocation8 + $0x28c] sm:$0xf0]  ;;  %v1635_v6 = vor.u32 %v2006_v62, %v1634_v60 }
  0x21   :  { %v1763_v7 = vor.u32 %v2038_v4, %v1762_v63  ;;  %v1890_v12 = vld [vmem:[#allocation8 + $0x380] sm:$0xf]  ;;  %v2070_v13 = vld [vmem:[#allocation8 + $0x38c] sm:$0xf0] }
  0x22   :  { %1117 = vmatpush.bf16.msra.mxu0 %v1507_v61  ;;  %v1891_v14 = vor.u32 %v2070_v13, %v1890_v12  ;;  %1131 = vmatpush.bf16.msra.mxu1 %v1635_v6  ;;  %v1490_v15 = vld [vmem:[#allocation8 + $0x60] sm:$0xf]  ;;  %v1970_v16 = vld [vmem:[#allocation8 + $0x6c] sm:$0xf0]  ;;  %v1984_v6 = vld [vmem:[#allocation8 + $0xe4] sm:$0xf]  ;;  %v2382_v13 = vsel %vm141_vm0, %v2371_v56, %v140_v48 }
  0x23   :  { %1145 = vmatpush.bf16.msra.mxu2 %v1763_v7  ;;  %v1618_v17 = vld [vmem:[#allocation8 + $0x160] sm:$0xf]  ;;  %v1491_v18 = vor.u32 %v1970_v16, %v1490_v15  ;;  %v2002_v19 = vld [vmem:[#allocation8 + $0x16c] sm:$0xf0]  ;;  %v1556_v7 = vld [vmem:[#allocation8 + $0xf0] sm:$0xf0] }
  0x24   :  { %1159 = vmatpush.bf16.msra.mxu3 %v1891_v14  ;;  %v1746_v20 = vld [vmem:[#allocation8 + $0x260] sm:$0xf]  ;;  %v2034_v21 = vld [vmem:[#allocation8 + $0x26c] sm:$0xf0]  ;;  %v1619_v23 = vor.u32 %v2002_v19, %v1618_v17  ;;  %v1559_v16 = vor.u32 %v1984_v6, %v1556_v7  ;;  %v2016_v17 = vld [vmem:[#allocation8 + $0x1e4] sm:$0xf] }
  0x25   :  { %v1747_v24 = vor.u32 %v2034_v21, %v1746_v20  ;;  %v1874_v25 = vld [vmem:[#allocation8 + $0x360] sm:$0xf]  ;;  %v2066_v26 = vld [vmem:[#allocation8 + $0x36c] sm:$0xf0]  ;;  %v2048_v19 = vld [vmem:[#allocation8 + $0x2e4] sm:$0xf] }
  0x26   :  { %1118 = vmatpush.bf16.msra.mxu0 %v1491_v18  ;;  %v1875_v27 = vor.u32 %v2066_v26, %v1874_v25  ;;  %1132 = vmatpush.bf16.msra.mxu1 %v1619_v23  ;;  %v1474_v28 = vld [vmem:[#allocation8 + $0x40] sm:$0xf]  ;;  %v1966_v29 = vld [vmem:[#allocation8 + $0x4c] sm:$0xf0]  ;;  %v1684_v18 = vld [vmem:[#allocation8 + $0x1f0] sm:$0xf0] }
  0x27   :  { %1146 = vmatpush.bf16.msra.mxu2 %v1747_v24  ;;  %v1602_v30 = vld [vmem:[#allocation8 + $0x140] sm:$0xf]  ;;  %v1475_v31 = vor.u32 %v1966_v29, %v1474_v28  ;;  %v1998_v32 = vld [vmem:[#allocation8 + $0x14c] sm:$0xf0]  ;;  %v1687_v21 = vor.u32 %v2016_v17, %v1684_v18  ;;  %v2080_v23 = vld [vmem:[#allocation8 + $0x3e4] sm:$0xf]  ;;  %v1815_v24 = vor.u32 %v2048_v19, %v1812_v22 }
  0x28   :  { %1160 = vmatpush.bf16.msra.mxu3 %v1875_v27  ;;  %v1730_v33 = vld [vmem:[#allocation8 + $0x240] sm:$0xf]  ;;  %v2030_v34 = vld [vmem:[#allocation8 + $0x24c] sm:$0xf0]  ;;  %v1603_v36 = vor.u32 %v1998_v32, %v1602_v30  ;;  %v1940_v25 = vld [vmem:[#allocation8 + $0x3f0] sm:$0xf0] }
  0x29   :  { %v1731_v37 = vor.u32 %v2030_v34, %v1730_v33  ;;  %v1858_v38 = vld [vmem:[#allocation8 + $0x340] sm:$0xf]  ;;  %v2062_v39 = vld [vmem:[#allocation8 + $0x34c] sm:$0xf0]  ;;  %v1980_v26 = vld [vmem:[#allocation8 + $0xc4] sm:$0xf]  ;;  %v1943_v28 = vor.u32 %v2080_v23, %v1940_v25 }
  0x2a   :  { %1119 = vmatpush.bf16.msra.mxu0 %v1475_v31  ;;  %v1859_v40 = vor.u32 %v2062_v39, %v1858_v38  ;;  %1133 = vmatpush.bf16.msra.mxu1 %v1603_v36  ;;  %v1458_v41 = vld [vmem:[#allocation8 + $0x20] sm:$0xf]  ;;  %v1962_v42 = vld [vmem:[#allocation8 + $0x2c] sm:$0xf0]  ;;  %v1540_v27 = vld [vmem:[#allocation8 + $0xd0] sm:$0xf0] }
  0x2b   :  { %1147 = vmatpush.bf16.msra.mxu2 %v1731_v37  ;;  %v1586_v43 = vld [vmem:[#allocation8 + $0x120] sm:$0xf]  ;;  %v1459_v44 = vor.u32 %v1962_v42, %v1458_v41  ;;  %v1994_v45 = vld [vmem:[#allocation8 + $0x12c] sm:$0xf0]  ;;  %v1543_v29 = vor.u32 %v1980_v26, %v1540_v27  ;;  %v2012_v30 = vld [vmem:[#allocation8 + $0x1c4] sm:$0xf] }
  0x2c   :  { %1161 = vmatpush.bf16.msra.mxu3 %v1859_v40  ;;  %v1714_v46 = vld [vmem:[#allocation8 + $0x220] sm:$0xf]  ;;  %v2026_v47 = vld [vmem:[#allocation8 + $0x22c] sm:$0xf0]  ;;  %v1587_v49 = vor.u32 %v1994_v45, %v1586_v43  ;;  %v1668_v31 = vld [vmem:[#allocation8 + $0x1d0] sm:$0xf0] }
  0x2d   :  { %v1715_v50 = vor.u32 %v2026_v47, %v1714_v46  ;;  %v1842_v51 = vld [vmem:[#allocation8 + $0x320] sm:$0xf]  ;;  %v2058_v52 = vld [vmem:[#allocation8 + $0x32c] sm:$0xf0]  ;;  %v2044_v32 = vld [vmem:[#allocation8 + $0x2c4] sm:$0xf]  ;;  %v1671_v33 = vor.u32 %v2012_v30, %v1668_v31 }
  0x2e   :  { %v1442_v53 = vld [vmem:[#allocation8] sm:$0xf]  ;;  %1120 = vmatpush.bf16.msra.mxu0 %v1459_v44  ;;  %v1843_v54 = vor.u32 %v2058_v52, %v1842_v51  ;;  %v1958_v55 = vld [vmem:[#allocation8 + $0xc] sm:$0xf0]  ;;  %1134 = vmatpush.bf16.msra.mxu1 %v1587_v49  ;;  %v1796_v34 = vld [vmem:[#allocation8 + $0x2d0] sm:$0xf0] }
  0x2f   :  { %v1570_v57 = vld [vmem:[#allocation8 + $0x100] sm:$0xf]  ;;  %v1990_v58 = vld [vmem:[#allocation8 + $0x10c] sm:$0xf0]  ;;  %1148 = vmatpush.bf16.msra.mxu2 %v1715_v50  ;;  %v1443_v59 = vor.u32 %v1958_v55, %v1442_v53  ;;  %v1924_v36 = vld [vmem:[#allocation8 + $0x3d0] sm:$0xf0]  ;;  %v1799_v38 = vor.u32 %v2044_v32, %v1796_v34 }
  0x30   :  { %v1571_v60 = vor.u32 %v1990_v58, %v1570_v57  ;;  %v1698_v61 = vld [vmem:[#allocation8 + $0x200] sm:$0xf]  ;;  %v2022_v62 = vld [vmem:[#allocation8 + $0x20c] sm:$0xf0]  ;;  %1162 = vmatpush.bf16.msra.mxu3 %v1843_v54  ;;  %v1927_v39 = vor.u32 %v2076_v35, %v1924_v36  ;;  %v1976_v40 = vld [vmem:[#allocation8 + $0xa4] sm:$0xf] }
  0x31   :  { %v1826_v63 = vld [vmem:[#allocation8 + $0x300] sm:$0xf]  ;;  %v1699_v4 = vor.u32 %v2022_v62, %v1698_v61  ;;  %v2054_v5 = vld [vmem:[#allocation8 + $0x30c] sm:$0xf0]  ;;  %v1524_v41 = vld [vmem:[#allocation8 + $0xb0] sm:$0xf0] }
  0x32   :  { %v1827_v15 = vor.u32 %v2054_v5, %v1826_v63  ;;  %1121 = vmatpush.bf16.msra.mxu0 %v1443_v59  ;;  %1135 = vmatpush.bf16.msra.mxu1 %v1571_v60  ;;  %v2008_v42 = vld [vmem:[#allocation8 + $0x1a4] sm:$0xf]  ;;  %v1652_v43 = vld [vmem:[#allocation8 + $0x1b0] sm:$0xf0]  ;;  %v1527_v45 = vor.u32 %v1976_v40, %v1524_v41 }
  0x33   :  { %1149 = vmatpush.bf16.msra.mxu2 %v1699_v4  ;;  %v2040_v44 = vld [vmem:[#allocation8 + $0x2a4] sm:$0xf]  ;;  %v1780_v46 = vld [vmem:[#allocation8 + $0x2b0] sm:$0xf0]  ;;  %v1655_v51 = vor.u32 %v2008_v42, %v1652_v43 }
  0x34   :  { %1163 = vmatpush.bf16.msra.mxu3 %v1827_v15  ;;  %v2072_v47 = vld [vmem:[#allocation8 + $0x3a4] sm:$0xf]  ;;  %v1908_v48 = vld [vmem:[#allocation8 + $0x3b0] sm:$0xf0]  ;;  %v1783_v52 = vor.u32 %v2040_v44, %v1780_v46  ;;  %v76_v44 = vmul.f32 %v2355_v8, %v2355_v8 }
  0x35   :  { %v1972_v53 = vld [vmem:[#allocation8 + $0x84] sm:$0xf]  ;;  %v1508_v54 = vld [vmem:[#allocation8 + $0x90] sm:$0xf0]  ;;  %v1911_v57 = vor.u32 %v2072_v47, %v1908_v48 }
  0x36   :  { %1170 = vmatpush.bf16.msrb.mxu0 %v1559_v16  ;;  %1184 = vmatpush.bf16.msrb.mxu1 %v1687_v21  ;;  %v2004_v58 = vld [vmem:[#allocation8 + $0x184] sm:$0xf]  ;;  %v1636_v59 = vld [vmem:[#allocation8 + $0x190] sm:$0xf0]  ;;  %v1511_v5 = vor.u32 %v1972_v53, %v1508_v54 }
  0x37   :  { %1198 = vmatpush.bf16.msrb.mxu2 %v1815_v24  ;;  %v2036_v60 = vld [vmem:[#allocation8 + $0x284] sm:$0xf]  ;;  %v1764_v61 = vld [vmem:[#allocation8 + $0x290] sm:$0xf0]  ;;  %v1639_v7 = vor.u32 %v2004_v58, %v1636_v59  ;;  %v2426_v59 = vmul.f32 %v2357_v9, %v2357_v9 }
  0x38   :  { %1212 = vmatpush.bf16.msrb.mxu3 %v1943_v28  ;;  %v2068_v62 = vld [vmem:[#allocation8 + $0x384] sm:$0xf]  ;;  %v1892_v63 = vld [vmem:[#allocation8 + $0x390] sm:$0xf0] }
  0x39   :  { %v1968_v6 = vld [vmem:[#allocation8 + $0x64] sm:$0xf]  ;;  %v1492_v15 = vld [vmem:[#allocation8 + $0x70] sm:$0xf0] }
  0x3a   :  { %1171 = vmatpush.bf16.msrb.mxu0 %v1543_v29  ;;  %1185 = vmatpush.bf16.msrb.mxu1 %v1671_v33  ;;  %v2000_v16 = vld [vmem:[#allocation8 + $0x164] sm:$0xf]  ;;  %v1620_v17 = vld [vmem:[#allocation8 + $0x170] sm:$0xf0]  ;;  %v1495_v25 = vor.u32 %v1968_v6, %v1492_v15  ;;  %v2438_v6 = vmul.f32 %v2361_v11, %v2361_v11 }
  0x3b   :  { %1199 = vmatpush.bf16.msrb.mxu2 %v1799_v38  ;;  %v2032_v21 = vld [vmem:[#allocation8 + $0x264] sm:$0xf]  ;;  %v1748_v22 = vld [vmem:[#allocation8 + $0x270] sm:$0xf0] }
  0x3c   :  { %1213 = vmatpush.bf16.msrb.mxu3 %v1927_v39  ;;  %v1876_v24 = vld [vmem:[#allocation8 + $0x370] sm:$0xf0]  ;;  %v1751_v28 = vor.u32 %v2032_v21, %v1748_v22  ;;  %v1964_v41 = vld [vmem:[#allocation8 + $0x44] sm:$0xf] }
  0x3d   :  { %v1476_v42 = vld [vmem:[#allocation8 + $0x50] sm:$0xf0]  ;;  %v1996_v43 = vld [vmem:[#allocation8 + $0x144] sm:$0xf] }
  0x3e   :  { %1172 = vmatpush.bf16.msrb.mxu0 %v1527_v45  ;;  %1186 = vmatpush.bf16.msrb.mxu1 %v1655_v51  ;;  %v77_v45 = vmul.f32 %v2359_v10, %v2359_v10  ;;  %v1479_v48 = vor.u32 %v1964_v41, %v1476_v42  ;;  %v2028_v51 = vld [vmem:[#allocation8 + $0x244] sm:$0xf]  ;;  %v1860_v58 = vld [vmem:[#allocation8 + $0x350] sm:$0xf0] }
  0x3f   :  { %1200 = vmatpush.bf16.msrb.mxu2 %v1783_v52  ;;  %v1732_v52 = vld [vmem:[#allocation8 + $0x250] sm:$0xf0]  ;;  %v2056_v42 = vld [vmem:[#allocation8 + $0x324] sm:$0xf] }
  0x40   :  { %1214 = vmatpush.bf16.msrb.mxu3 %v1911_v57  ;;  %v2060_v57 = vld [vmem:[#allocation8 + $0x344] sm:$0xf]  ;;  %v1716_v41 = vld [vmem:[#allocation8 + $0x230] sm:$0xf0] }
  0x42   :  { %1173 = vmatpush.bf16.msrb.mxu0 %v1511_v5  ;;  %1187 = vmatpush.bf16.msrb.mxu1 %v1639_v7  ;;  %v1863_v5 = vor.u32 %v2060_v57, %v1860_v58  ;;  %v85_v7 = vadd.f32 %v77_v45, %v76_v44 }
  0x46   :  { %1174 = vmatpush.bf16.msrb.mxu0 %v1495_v25 }
  0x4a   :  { %1175 = vmatpush.bf16.msrb.mxu0 %v1479_v48 }
  0x88   :  { %v2377_v12 = vpop.xlane.xlu1 %127  ;;  %v118_v14 = vpop.xlane.xlu0 %117 }
  0x89   :  { %v134_v20 = vsub.f32 %v118_v14, %v2377_v12  ;;  %v1767_v14 = vor.u32 %v2036_v60, %v1764_v61  ;;  %v175_v32 = vsub.f32 0.0, %v2377_v12 }
  0x8b   :  { %v143_v56 = vmul.f32 %v2382_v13, %v134_v20  ;;  %v1895_v20 = vor.u32 %v2068_v62, %v1892_v63  ;;  %1201 = vmatpush.bf16.msrb.mxu2 %v1767_v14 }
  0x8d   :  { %v2386_v37 = vmax.f32 %v143_v56, 1e-08  ;;  %v1623_v56 = vor.u32 %v2000_v16, %v1620_v17  ;;  %1215 = vmatpush.bf16.msrb.mxu3 %v1895_v20 }
  0x8f   :  { %2179 = vrcp.f32 %v2386_v37  ;;  %v158_v26 = vand.u32 2147483648, %v2386_v37  ;;  %v156_v29 = vand.u32 2147483647, %v2386_v37  ;;  %vm152_vm2 = vweird.f32 %v2386_v37  ;;  %1188 = vmatpush.bf16.msrb.mxu1 %v1623_v56  ;;  %1202 = vmatpush.bf16.msrb.mxu2 %v1751_v28 }
  0x90   :  { %v2389_v49 = vpop.xlane.xlu1 %132  ;;  %v123_v50 = vpop.xlane.xlu0 %122 }
  0x91   :  { %v135_v55 = vsub.f32 %v123_v50, %v2389_v49  ;;  %v176_v33 = vsub.f32 0.0, %v2389_v49  ;;  %vm2407_vm4 = vcmp.eq.f32.partialorder %v156_v29, 8.507059e+37  ;;  %v159_v39 = vor.u32 1.1754944e-38, %v158_v26  ;;  %v1604_v50 = vld [vmem:[#allocation8 + $0x150] sm:$0xf0] }
  0x92   :  { %v1607_v54 = vor.u32 %v1996_v43, %v1604_v50  ;;  %v1960_v26 = vld [vmem:[#allocation8 + $0x24] sm:$0xf] }
  0x93   :  { %v144_v4 = vmul.f32 %v2382_v13, %v135_v55  ;;  %v2064_v13 = vld [vmem:[#allocation8 + $0x364] sm:$0xf]  ;;  %v1735_v55 = vor.u32 %v2028_v51, %v1732_v52 }
  0x94   :  { %v1879_v30 = vor.u32 %v2064_v13, %v1876_v24  ;;  %1189 = vmatpush.bf16.msrb.mxu1 %v1607_v54 }
  0x95   :  { %v2180_v18 = vpop.eup %2179  ;;  %v2393_v19 = vmax.f32 %v144_v4, 1e-08  ;;  %1203 = vmatpush.bf16.msrb.mxu2 %v1735_v55 }
  0x96   :  { %v148_v23 = vmul.f32 %v2180_v18, %v2386_v37  ;;  %vm153_vm1 = vweird.f32 %v2180_v18  ;;  %1216 = vmatpush.bf16.msrb.mxu3 %v1879_v30 }
  0x97   :  { %2181 = vrcp.f32 %v2393_v19  ;;  %v172_v34 = vand.u32 2147483648, %v2393_v19  ;;  %vm2403_vm3 = vmor %vm152_vm2, %vm153_vm1  ;;  %v170_v12 = vand.u32 2147483647, %v2393_v19  ;;  %vm166_vm6 = vweird.f32 %v2393_v19 }
  0x98   :  { %v149_v27 = vsub.f32 1.0, %v148_v23 }
  0x99   :  { %v2434_v4 = vor.u32 1.1754944e-38, %v172_v34  ;;  %vm2473_vm10 = vcmp.eq.f32.partialorder %v170_v12, 8.507059e+37 }
  0x9a   :  { %v150_v31 = vmul.f32 %v2180_v18, %v149_v27  ;;  %1217 = vmatpush.bf16.msrb.mxu3 %v1863_v5  ;;  %v1460_v27 = vld [vmem:[#allocation8 + $0x30] sm:$0xf0] }
  0x9b   :  { %v1463_v58 = vor.u32 %v1960_v26, %v1460_v27 }
  0x9c   :  { %v151_v35 = vadd.f32 %v2180_v18, %v150_v31  ;;  %v1992_v31 = vld [vmem:[#allocation8 + $0x124] sm:$0xf] }
  0x9d   :  { %v2412_v40 = vpop.eup %2181  ;;  %1176 = vmatpush.bf16.msrb.mxu0 %v1463_v58 }
  0x9e   :  { %v162_v46 = vmul.f32 %v2412_v40, %v2393_v19  ;;  %v155_v47 = vsel %vm2403_vm3, %v2180_v18, %v151_v35  ;;  %vm167_vm5 = vweird.f32 %v2412_v40 }
  0x9f   :  { %v160_v53 = vsel %vm2407_vm4, %v159_v39, %v155_v47  ;;  %v2024_v39 = vld [vmem:[#allocation8 + $0x224] sm:$0xf]  ;;  %vm168_vm13 = vmor %vm166_vm6, %vm167_vm5 }
  0xa0   :  { %v163_v60 = vsub.f32 1.0, %v162_v46  ;;  %v177_v61 = vmul.f32 %v175_v32, %v160_v53  ;;  %v2429_v62 = vmul.f32 %v160_v53, %v2339_v0  ;;  %v2432_v63 = vmul.f32 %v160_v53, %v2341_v1  ;;  %v1588_v32 = vld [vmem:[#allocation8 + $0x130] sm:$0xf0] }
  0xa1   :  { %v2441_v16 = vmul.f32 %v160_v53, %v2343_v2  ;;  %v2444_v17 = vmul.f32 %v160_v53, %v2345_v3  ;;  %v1844_v53 = vld [vmem:[#allocation8 + $0x330] sm:$0xf0]  ;;  %v1591_v12 = vor.u32 %v1992_v31, %v1588_v32 }
  0xa2   :  { %v2084_v14 = vand.u32 2147483647, %v177_v61  ;;  %v2086_v15 = vcvt.f32.s32 %v177_v61  ;;  %v164_v18 = vmul.f32 %v2412_v40, %v163_v60  ;;  %v2100_v20 = vand.u32 2147483647, %v2429_v62 }
  0xa3   :  { %v2102_v21 = vcvt.f32.s32 %v2429_v62  ;;  %v2108_v22 = vand.u32 2147483647, %v2432_v63  ;;  %v2089_v13 = vand.u32 2147483648, %v177_v61  ;;  %v2105_v24 = vand.u32 2147483648, %v2429_v62  ;;  %1190 = vmatpush.bf16.msrb.mxu1 %v1591_v12 }
  0xa4   :  { %v2087_v23 = vcvt.s32.f32 %v2086_v15  ;;  %v2110_v25 = vcvt.f32.s32 %v2432_v63  ;;  %vm2454_vm7 = vcmp.lt.f32.partialorder %v2084_v14, 8388608.0  ;;  %vm2458_vm8 = vcmp.lt.f32.partialorder %v2100_v20, 8388608.0 }
  0xa5   :  { %v2103_v29 = vcvt.s32.f32 %v2102_v21  ;;  %v2113_v30 = vand.u32 2147483648, %v2432_v63  ;;  %vm2463_vm9 = vcmp.lt.f32.partialorder %v2108_v22, 8388608.0  ;;  %v2118_v38 = vcvt.f32.s32 %v2441_v16 }
  0xa6   :  { %v2088_v34 = vand.u32 2147483647, %v2087_v23  ;;  %v2111_v36 = vcvt.s32.f32 %v2110_v25  ;;  %v2116_v44 = vand.u32 2147483647, %v2441_v16  ;;  %v2121_v45 = vand.u32 2147483648, %v2441_v16 }
  0xa7   :  { %v2104_v43 = vand.u32 2147483647, %v2103_v29  ;;  %v2126_v46 = vcvt.f32.s32 %v2444_v17  ;;  %v2119_v51 = vcvt.s32.f32 %v2118_v38  ;;  %v2124_v52 = vand.u32 2147483647, %v2444_v17 }
  0xa8   :  { %v2090_v48 = vor.u32 %v2089_v13, %v2088_v34  ;;  %v2112_v50 = vand.u32 2147483647, %v2111_v36  ;;  %v2129_v57 = vand.u32 2147483648, %v2444_v17  ;;  %v1719_v21 = vor.u32 %v2024_v39, %v1716_v41 }
  0xa9   :  { %v2106_v54 = vor.u32 %v2105_v24, %v2104_v43  ;;  %v2127_v55 = vcvt.s32.f32 %v2126_v46  ;;  %v2120_v14 = vand.u32 2147483647, %v2119_v51  ;;  %v1847_v22 = vor.u32 %v2056_v42, %v1844_v53 }
  0xaa   :  { %v2091_v60 = vsel %vm2454_vm7, %v2090_v48, %v177_v61  ;;  %v2114_v5 = vor.u32 %v2113_v30, %v2112_v50  ;;  %v86_v61 = vadd.f32 %v85_v7, %v2426_v59  ;;  %vm2117_vm11 = vcmp.lt.f32.partialorder %v2116_v44, 8388608.0  ;;  %1204 = vmatpush.bf16.msrb.mxu2 %v1719_v21 }
  0xab   :  { %v2107_v15 = vsel %vm2458_vm8, %v2106_v54, %v2429_v62  ;;  %v2128_v20 = vand.u32 2147483647, %v2127_v55  ;;  %v2122_v13 = vor.u32 %v2121_v45, %v2120_v14  ;;  %1218 = vmatpush.bf16.msrb.mxu3 %v1847_v22  ;;  %v165_v62 = vadd.f32 %v2412_v40, %v164_v18 }
  0xac   :  { %v2115_v23 = vsel %vm2463_vm9, %v2114_v5, %v2432_v63  ;;  %v197_v24 = vadd.f32 %v2107_v15, %v2091_v60  ;;  %vm2125_vm12 = vcmp.lt.f32.partialorder %v2124_v52, 8388608.0  ;;  %v87_v28 = vadd.f32 %v86_v61, %v2438_v6  ;;  %v1444_v61 = vld [vmem:[#allocation8 + $0x10] sm:$0xf0] }
  0xad   :  { %v2130_v25 = vor.u32 %v2129_v57, %v2128_v20  ;;  %v198_v26 = vadd.f32 %v2115_v23, %v2091_v60  ;;  %v2123_v27 = vsel %vm2117_vm11, %v2122_v13, %v2441_v16  ;;  %v169_v29 = vsel %vm168_vm13, %v2412_v40, %v165_v62 }
  0xae   :  { %v205_v56 = vmax.f32 %v197_v24, 0.0  ;;  %v199_v63 = vadd.f32 %v2123_v27, %v2091_v60  ;;  %88 = vadd.xlane.f32.xlu1 %v87_v28  ;;  %v174_v16 = vsel %vm2473_vm10, %v2434_v4, %v169_v29  ;;  %v2504_v34 = vmul.f32 %v2339_v0, %v2339_v0  ;;  %v1956_v24 = vld [vmem:[#allocation8 + $0x4] sm:$0xf]  ;;  %v1572_v28 = vld [vmem:[#allocation8 + $0x110] sm:$0xf0] }
  0xaf   :  { %v2131_v59 = vsel %vm2125_vm12, %v2130_v25, %v2444_v17  ;;  %v206_v7 = vmax.f32 %v198_v26, 0.0  ;;  %v178_v32 = vmul.f32 %v176_v33, %v174_v16  ;;  %v2507_v40 = vmul.f32 %v174_v16, %v2355_v8  ;;  %v1690_v26 = vld [vmem:[#allocation8 + $0x1e8] sm:$0xf] }
  0xb0   :  { %v200_v30 = vadd.f32 %v2131_v59, %v2091_v60  ;;  %v213_v31 = vmin.f32 %v205_v56, 255.0  ;;  %v207_v18 = vmax.f32 %v199_v63, 0.0  ;;  %v2510_v36 = vmul.f32 %v174_v16, %v2359_v10  ;;  %v1988_v56 = vld [vmem:[#allocation8 + $0x104] sm:$0xf] }
  0xb1   :  { %v214_v6 = vmin.f32 %v206_v7, 255.0  ;;  %v2092_v4 = vand.u32 2147483647, %v178_v32  ;;  %v2094_v41 = vcvt.f32.s32 %v178_v32  ;;  %v2097_v49 = vand.u32 2147483648, %v178_v32 }
  0xb2   :  { %v208_v17 = vmax.f32 %v200_v30, 0.0  ;;  %v221_v35 = vsub.f32 %v213_v31, %v2091_v60  ;;  %v215_v38 = vmin.f32 %v207_v18, 255.0  ;;  %v2513_v33 = vmul.f32 %v174_v16, %v2357_v9  ;;  %v2020_v30 = vld [vmem:[#allocation8 + $0x204] sm:$0xf] }
  0xb3   :  { %v222_v39 = vsub.f32 %v214_v6, %v2091_v60  ;;  %v2516_v46 = vmul.f32 %v174_v16, %v2361_v11  ;;  %v2095_v47 = vcvt.s32.f32 %v2094_v41  ;;  %v2132_v10 = vand.u32 2147483647, %v2507_v40 }
  0xb4   :  { %v216_v42 = vmin.f32 %v208_v17, 255.0  ;;  %v237_v43 = vmul.f32 %v221_v35, %v221_v35  ;;  %v223_v0 = vsub.f32 %v215_v38, %v2091_v60  ;;  %v2134_v48 = vcvt.f32.s32 %v2507_v40 }
  0xb5   :  { %v238_v44 = vmul.f32 %v222_v39, %v222_v39  ;;  %v229_v45 = vpack.c.bf16 %v222_v39, %v221_v35  ;;  %vm2520_vm14 = vcmp.lt.f32.partialorder %v2092_v4, 8388608.0  ;;  %v2140_v9 = vand.u32 2147483647, %v2510_v36 }
  0xb6   :  { %v224_v8 = vsub.f32 %v216_v42, %v2091_v60  ;;  %v239_v50 = vmul.f32 %v223_v0, %v223_v0  ;;  %v2096_v55 = vand.u32 2147483647, %v2095_v47  ;;  %v2137_v11 = vand.u32 2147483648, %v2507_v40 }
  0xb7   :  { %v245_v51 = vadd.f32 %v238_v44, %v237_v43  ;;  %233 = vst [vmem:[#allocation2] sm:$0xff] %v229_v45  ;;  %vm2526_vm15 = vcmp.lt.f32.partialorder %v2132_v10, 8388608.0  ;;  %v2135_v60 = vcvt.s32.f32 %v2134_v48  ;;  %v2142_v5 = vcvt.f32.s32 %v2510_v36 }
  0xb8   :  { %v230_v53 = vpack.c.bf16 %v224_v8, %v223_v0  ;;  %v240_v54 = vmul.f32 %v224_v8, %v224_v8  ;;  %v2098_v14 = vor.u32 %v2097_v49, %v2096_v55  ;;  %vm2531_vm0 = vcmp.lt.f32.partialorder %v2140_v9, 8388608.0  ;;  %v2052_v49 = vld [vmem:[#allocation8 + $0x304] sm:$0xf] }
  0xb9   :  { %v246_v57 = vadd.f32 %v245_v51, %v239_v50  ;;  %v2148_v15 = vand.u32 2147483647, %v2513_v33  ;;  %v2150_v20 = vcvt.f32.s32 %v2513_v33  ;;  %v2136_v22 = vand.u32 2147483647, %v2135_v60 }
  0xba   :  { %234 = vst [vmem:[#allocation2 + $0x8] sm:$0xff] %v230_v53  ;;  %v2143_v23 = vcvt.s32.f32 %v2142_v5  ;;  %v2145_v13 = vand.u32 2147483648, %v2510_v36  ;;  %v2099_v25 = vsel %vm2520_vm14, %v2098_v14, %v178_v32  ;;  %v2153_v27 = vand.u32 2147483648, %v2513_v33  ;;  %v1700_v32 = vld [vmem:[#allocation8 + $0x210] sm:$0xf0] }
  0xbb   :  { %v247_v21 = vadd.f32 %v246_v57, %v240_v54  ;;  %vm2540_vm1 = vcmp.lt.f32.partialorder %v2148_v15, 8388608.0  ;;  %v2151_v62 = vcvt.s32.f32 %v2150_v20  ;;  %v2138_v59 = vor.u32 %v2137_v11, %v2136_v22 }
  0xbc   :  { %v2144_v63 = vand.u32 2147483647, %v2143_v23  ;;  %v2156_v7 = vand.u32 2147483647, %v2516_v46  ;;  %v2158_v29 = vcvt.f32.s32 %v2516_v46  ;;  %v2161_v16 = vand.u32 2147483648, %v2516_v46 }
  0xbd   :  { %248 = vadd.xlane.f32.xlu2 %v247_v21  ;;  %v2152_v31 = vand.u32 2147483647, %v2151_v62  ;;  %v73_v18 = vmul.f32 %v2341_v1, %v2341_v1  ;;  %v74_v6 = vmul.f32 %v2343_v2, %v2343_v2  ;;  %v2139_v17 = vsel %vm2526_vm15, %v2138_v59, %v2507_v40  ;;  %v1828_v1 = vld [vmem:[#allocation8 + $0x310] sm:$0xf0]  ;;  %v2019_v62 = vld [vmem:[#allocation8 + $0x1f4] sm:$0xf0] }
  0xbe   :  { %v2146_v35 = vor.u32 %v2145_v13, %v2144_v63  ;;  %v2159_v38 = vcvt.s32.f32 %v2158_v29  ;;  %v75_v39 = vmul.f32 %v2345_v3, %v2345_v3  ;;  %v201_v41 = vadd.f32 %v2139_v17, %v2099_v25  ;;  %v1562_v13 = vld [vmem:[#allocation8 + $0xe8] sm:$0xf]  ;;  %v1952_v63 = vld [vmem:[#allocation2 + $0x4] sm:$0xf] }
  0xbf   :  { %v2154_v4 = vor.u32 %v2153_v27, %v2152_v31  ;;  %v80_v42 = vadd.f32 %v73_v18, %v2504_v34  ;;  %v1447_v43 = vor.u32 %v1956_v24, %v1444_v61  ;;  %v1575_v44 = vor.u32 %v1988_v56, %v1572_v28  ;;  %v1987_v24 = vld [vmem:[#allocation8 + $0xf4] sm:$0xf0]  ;;  %v1426_v27 = vld [vmem:[#allocation2] sm:$0xf]  ;;  %v1818_v56 = vld [vmem:[#allocation8 + $0x2e8] sm:$0xf] }
  0xc0   :  { %v2147_v2 = vsel %vm2531_vm0, %v2146_v35, %v2510_v36  ;;  %v2160_v0 = vand.u32 2147483647, %v2159_v38  ;;  %v1703_v45 = vor.u32 %v2020_v30, %v1700_v32  ;;  %v209_v3 = vmax.f32 %v201_v41, 0.0  ;;  %v2051_v28 = vld [vmem:[#allocation8 + $0x2f4] sm:$0xf0] }
  0xc1   :  { %v2155_v40 = vsel %vm2540_vm1, %v2154_v4, %v2513_v33  ;;  %v202_v8 = vadd.f32 %v2147_v2, %v2099_v25  ;;  %v81_v47 = vadd.f32 %v80_v42, %v74_v6  ;;  %1177 = vmatpush.bf16.msrb.mxu0 %v1447_v43  ;;  %1191 = vmatpush.bf16.msrb.mxu1 %v1575_v44  ;;  %vm2157_vm2 = vcmp.lt.f32.partialorder %v2156_v7, 8388608.0  ;;  %v2083_v18 = vld [vmem:[#allocation8 + $0x3f4] sm:$0xf0]  ;;  %v1546_v6 = vld [vmem:[#allocation8 + $0xc8] sm:$0xf] }
  0xc2   :  { %v2162_v10 = vor.u32 %v2161_v16, %v2160_v0  ;;  %v203_v34 = vadd.f32 %v2155_v40, %v2099_v25  ;;  %1205 = vmatpush.bf16.msrb.mxu2 %v1703_v45  ;;  %v1831_v48 = vor.u32 %v2052_v49, %v1828_v1  ;;  %v217_v51 = vmin.f32 %v209_v3, 255.0  ;;  %v1946_v16 = vld [vmem:[#allocation8 + $0x3e8] sm:$0xf]  ;;  %v1983_v32 = vld [vmem:[#allocation8 + $0xd4] sm:$0xf0] }
  0xc3   :  { %v210_v50 = vmax.f32 %v202_v8, 0.0  ;;  %v82_v36 = vadd.f32 %v81_v47, %v75_v39  ;;  %v1691_v29 = vor.u32 %v2019_v62, %v1690_v26  ;;  %v1674_v17 = vld [vmem:[#allocation8 + $0x1c8] sm:$0xf]  ;;  %v2015_v35 = vld [vmem:[#allocation8 + $0x1d4] sm:$0xf0]  ;;  %v1819_v43 = vor.u32 %v2051_v28, %v1818_v56 }
  0xc4   :  { %v2163_v52 = vsel %vm2157_vm2, %v2162_v10, %v2516_v46  ;;  %v211_v9 = vmax.f32 %v203_v34, 0.0  ;;  %1219 = vmatpush.bf16.msrb.mxu3 %v1831_v48  ;;  %v225_v33 = vsub.f32 %v217_v51, %v2099_v25  ;;  %v1434_v38 = vld [vmem:[#allocation2 + $0x8] sm:$0xf]  ;;  %v1953_v39 = vld [vmem:[#allocation2 + $0xc] sm:$0xf]  ;;  %v1947_v49 = vor.u32 %v2083_v18, %v1946_v16 }
  0xc5   :  { %v204_v53 = vadd.f32 %v2163_v52, %v2099_v25  ;;  %v218_v54 = vmin.f32 %v210_v50, 255.0  ;;  %83 = vadd.xlane.f32.xlu0 %v82_v36  ;;  %v1802_v4 = vld [vmem:[#allocation8 + $0x2c8] sm:$0xf]  ;;  %v2047_v1 = vld [vmem:[#allocation8 + $0x2d4] sm:$0xf0]  ;;  %v1547_v44 = vor.u32 %v1983_v32, %v1546_v6  ;;  %v1675_v45 = vor.u32 %v2015_v35, %v1674_v17 }
  0xc6   :  { %v219_v55 = vmin.f32 %v211_v9, 255.0  ;;  %v241_v58 = vmul.f32 %v225_v33, %v225_v33  ;;  %v1930_v40 = vld [vmem:[#allocation8 + $0x3c8] sm:$0xf]  ;;  %v2079_v8 = vld [vmem:[#allocation8 + $0x3d4] sm:$0xf0]  ;;  %v1803_v48 = vor.u32 %v2047_v1, %v1802_v4  ;;  %vm317_vm13 = vcmask 7168  }
  0xc7   :  { %v212_v11 = vmax.f32 %v204_v53, 0.0  ;;  %v226_v57 = vsub.f32 %v218_v54, %v2099_v25  ;;  %v1530_v3 = vld [vmem:[#allocation8 + $0xa8] sm:$0xf]  ;;  %v1979_v47 = vld [vmem:[#allocation8 + $0xb4] sm:$0xf0]  ;;  %v1931_v50 = vor.u32 %v2079_v8, %v1930_v40 }
  0xc8   :  { %v227_v60 = vsub.f32 %v219_v55, %v2099_v25  ;;  %v1658_v10 = vld [vmem:[#allocation8 + $0x1a8] sm:$0xf]  ;;  %v2011_v34 = vld [vmem:[#allocation8 + $0x1b4] sm:$0xf0]  ;;  %v1531_v52 = vor.u32 %v1979_v47, %v1530_v3 }
  0xc9   :  { %v220_v5 = vmin.f32 %v212_v11, 255.0  ;;  %v242_v14 = vmul.f32 %v226_v57, %v226_v57  ;;  %v231_v12 = vpack.c.bf16 %v226_v57, %v225_v33  ;;  %v1786_v51 = vld [vmem:[#allocation8 + $0x2a8] sm:$0xf]  ;;  %v2043_v36 = vld [vmem:[#allocation8 + $0x2b4] sm:$0xf0]  ;;  %v1659_v9 = vor.u32 %v2011_v34, %v1658_v10 }
  0xca   :  { %v243_v20 = vmul.f32 %v227_v60, %v227_v60  ;;  %v1914_v53 = vld [vmem:[#allocation8 + $0x3a8] sm:$0xf]  ;;  %v2075_v54 = vld [vmem:[#allocation8 + $0x3b4] sm:$0xf0] }
  0xcb   :  { %v228_v15 = vsub.f32 %v220_v5, %v2099_v25  ;;  %v250_v21 = vadd.f32 %v242_v14, %v241_v58  ;;  %235 = vst [vmem:[#allocation2 + $0x10] sm:$0xff] %v231_v12  ;;  %v1563_v25 = vor.u32 %v1987_v24, %v1562_v13  ;;  %v1514_v33 = vld [vmem:[#allocation8 + $0x88] sm:$0xf]  ;;  %v1975_v55 = vld [vmem:[#allocation8 + $0x94] sm:$0xf0]  ;;  %v1787_v58 = vor.u32 %v2043_v36, %v1786_v51 }
  0xcc   :  { %v1642_v11 = vld [vmem:[#allocation8 + $0x188] sm:$0xf]  ;;  %v2007_v57 = vld [vmem:[#allocation8 + $0x194] sm:$0xf0]  ;;  %v1515_v12 = vor.u32 %v1975_v55, %v1514_v33  ;;  %v1985_v51 = vld [vmem:[#allocation8 + $0xec] sm:$0xf] }
  0xcd   :  { %v232_v22 = vpack.c.bf16 %v228_v15, %v227_v60  ;;  %v244_v46 = vmul.f32 %v228_v15, %v228_v15  ;;  %v251_v23 = vadd.f32 %v250_v21, %v243_v20  ;;  %v1915_v60 = vor.u32 %v2075_v54, %v1914_v53  ;;  %v1770_v5 = vld [vmem:[#allocation8 + $0x288] sm:$0xf]  ;;  %v2039_v14 = vld [vmem:[#allocation8 + $0x294] sm:$0xf0]  ;;  %v1564_v36 = vld [vmem:[#allocation8 + $0xf8] sm:$0xf0] }
  0xce   :  { %v1643_v15 = vor.u32 %v2007_v57, %v1642_v11  ;;  %v1898_v20 = vld [vmem:[#allocation8 + $0x388] sm:$0xf]  ;;  %v2071_v21 = vld [vmem:[#allocation8 + $0x394] sm:$0xf0]  ;;  %v1771_v24 = vor.u32 %v2039_v14, %v1770_v5  ;;  %v2049_v5 = vld [vmem:[#allocation8 + $0x2ec] sm:$0xf]  ;;  %v1567_v14 = vor.u32 %v1985_v51, %v1564_v36 }
  0xcf   :  { %236 = vst [vmem:[#allocation2 + $0x18] sm:$0xff] %v232_v22  ;;  %v252_v61 = vadd.f32 %v251_v23, %v244_v46  ;;  %v1498_v22 = vld [vmem:[#allocation8 + $0x68] sm:$0xf]  ;;  %v1971_v46 = vld [vmem:[#allocation8 + $0x74] sm:$0xf0] }
  0xd0   :  { %v1626_v23 = vld [vmem:[#allocation8 + $0x168] sm:$0xf]  ;;  %v2003_v13 = vld [vmem:[#allocation8 + $0x174] sm:$0xf0] }
  0xd1   :  { %253 = vadd.xlane.f32.xlu2 %v252_v61  ;;  %v1899_v61 = vor.u32 %v2071_v21, %v1898_v20  ;;  %v1754_v26 = vld [vmem:[#allocation8 + $0x268] sm:$0xf]  ;;  %v2035_v62 = vld [vmem:[#allocation8 + $0x274] sm:$0xf0]  ;;  %v1627_v56 = vor.u32 %v2003_v13, %v1626_v23  ;;  %v2081_v20 = vld [vmem:[#allocation8 + $0x3ec] sm:$0xf] }
  0xd2   :  { %v1954_v59 = vld [vmem:[#allocation2 + $0xc] sm:$0xf0]  ;;  %v1428_v7 = vld [vmem:[#allocation2 + $0x10] sm:$0xf0]  ;;  %v1882_v28 = vld [vmem:[#allocation8 + $0x368] sm:$0xf]  ;;  %v1755_v16 = vor.u32 %v2035_v62, %v1754_v26 }
  0xd3   :  { %v2565_v30 = vor.u32 %v1954_v59, %v1426_v27  ;;  %v2567_v31 = vor.u32 %v1952_v63, %v1428_v7  ;;  %v1499_v27 = vor.u32 %v1971_v46, %v1498_v22  ;;  %v2067_v59 = vld [vmem:[#allocation8 + $0x374] sm:$0xf0]  ;;  %v1482_v63 = vld [vmem:[#allocation8 + $0x48] sm:$0xf]  ;;  %v1948_v21 = vld [vmem:[#allocation8 + $0x3f8] sm:$0xf0] }
  0xd4   :  { %v1967_v7 = vld [vmem:[#allocation8 + $0x54] sm:$0xf0]  ;;  %v1883_v18 = vor.u32 %v2067_v59, %v1882_v28  ;;  %v1738_v6 = vld [vmem:[#allocation8 + $0x248] sm:$0xf]  ;;  %v1981_v23 = vld [vmem:[#allocation8 + $0xcc] sm:$0xf] }
  0xd5   :  { %1122 = vmatmul.bf16.vlgmr.msra.gmra.mxu0 %v2565_v30  ;;  %1136 = vmatmul.bf16.vlgmr.msra.gmra.mxu1 %v2567_v31  ;;  %v2031_v32 = vld [vmem:[#allocation8 + $0x254] sm:$0xf0]  ;;  %v1483_v17 = vor.u32 %v1967_v7, %v1482_v63  ;;  %v1466_v4 = vld [vmem:[#allocation8 + $0x28] sm:$0xf]  ;;  %v1548_v13 = vld [vmem:[#allocation8 + $0xd8] sm:$0xf0] }
  0xd6   :  { %v1955_v41 = vld [vmem:[#allocation2 + $0x14] sm:$0xf0]  ;;  %v1436_v42 = vld [vmem:[#allocation2 + $0x18] sm:$0xf0]  ;;  %1226 = vmatpush.bf16.msra.mxu0 %v1563_v25  ;;  %1240 = vmatpush.bf16.msra.mxu1 %v1691_v29  ;;  %v1610_v25 = vld [vmem:[#allocation8 + $0x148] sm:$0xf]  ;;  %v1551_v63 = vor.u32 %v1981_v23, %v1548_v13 }
  0xd7   :  { %v2571_v2 = vor.u32 %v1955_v41, %v1434_v38  ;;  %v2573_v0 = vor.u32 %v1953_v39, %v1436_v42  ;;  %v1999_v29 = vld [vmem:[#allocation8 + $0x154] sm:$0xf0]  ;;  %v1866_v38 = vld [vmem:[#allocation8 + $0x348] sm:$0xf]  ;;  %v2013_v26 = vld [vmem:[#allocation8 + $0x1cc] sm:$0xf] }
  0xd8   :  { %v1611_v35 = vor.u32 %v1999_v29, %v1610_v25  ;;  %v2063_v39 = vld [vmem:[#allocation8 + $0x354] sm:$0xf0]  ;;  %v1594_v42 = vld [vmem:[#allocation8 + $0x128] sm:$0xf]  ;;  %v1676_v62 = vld [vmem:[#allocation8 + $0x1d8] sm:$0xf0] }
  0xd9   :  { %1150 = vmatmul.bf16.vlgmr.msra.gmra.mxu2 %v2571_v2  ;;  %1164 = vmatmul.bf16.vlgmr.msra.gmra.mxu3 %v2573_v0  ;;  %v1963_v41 = vld [vmem:[#allocation8 + $0x34] sm:$0xf0]  ;;  %v1867_v1 = vor.u32 %v2063_v39, %v1866_v38  ;;  %v1850_v40 = vld [vmem:[#allocation8 + $0x328] sm:$0xf]  ;;  %v2077_v28 = vld [vmem:[#allocation8 + $0x3cc] sm:$0xf]  ;;  %v1679_v7 = vor.u32 %v2013_v26, %v1676_v62 }
  0xda   :  { %1254 = vmatpush.bf16.msra.mxu2 %v1819_v43  ;;  %1268 = vmatpush.bf16.msra.mxu3 %v1947_v49  ;;  %v1995_v43 = vld [vmem:[#allocation8 + $0x134] sm:$0xf0]  ;;  %v1739_v49 = vor.u32 %v2031_v32, %v1738_v6  ;;  %v1467_v8 = vor.u32 %v1963_v41, %v1466_v4  ;;  %v1450_v10 = vld [vmem:[#allocation8 + $0x8] sm:$0xf]  ;;  %v1932_v59 = vld [vmem:[#allocation8 + $0x3d8] sm:$0xf0] }
  0xdb   :  { %1227 = vmatpush.bf16.msra.mxu0 %v1547_v44  ;;  %1241 = vmatpush.bf16.msra.mxu1 %v1675_v45  ;;  %v1722_v44 = vld [vmem:[#allocation8 + $0x228] sm:$0xf]  ;;  %v2027_v45 = vld [vmem:[#allocation8 + $0x234] sm:$0xf0]  ;;  %v1595_v3 = vor.u32 %v1995_v43, %v1594_v42  ;;  %v1977_v25 = vld [vmem:[#allocation8 + $0xac] sm:$0xf] }
  0xdc   :  { %v2059_v47 = vld [vmem:[#allocation8 + $0x334] sm:$0xf0]  ;;  %v1723_v53 = vor.u32 %v2027_v45, %v1722_v44  ;;  %v1706_v33 = vld [vmem:[#allocation8 + $0x208] sm:$0xf]  ;;  %v1532_v29 = vld [vmem:[#allocation8 + $0xb8] sm:$0xf0] }
  0xdd   :  { %v1959_v34 = vld [vmem:[#allocation8 + $0x14] sm:$0xf0]  ;;  %v1851_v54 = vor.u32 %v2059_v47, %v1850_v40  ;;  %v2009_v6 = vld [vmem:[#allocation8 + $0x1ac] sm:$0xf]  ;;  %v1660_v32 = vld [vmem:[#allocation8 + $0x1b8] sm:$0xf0]  ;;  %v1535_v4 = vor.u32 %v1977_v25, %v1532_v29 }
  0xde   :  { %1255 = vmatpush.bf16.msra.mxu2 %v1803_v48  ;;  %1269 = vmatpush.bf16.msra.mxu3 %v1931_v50  ;;  %v1578_v48 = vld [vmem:[#allocation8 + $0x108] sm:$0xf]  ;;  %v1991_v50 = vld [vmem:[#allocation8 + $0x114] sm:$0xf0]  ;;  %v1451_v11 = vor.u32 %v1959_v34, %v1450_v10  ;;  %v2073_v38 = vld [vmem:[#allocation8 + $0x3ac] sm:$0xf]  ;;  %v1663_v41 = vor.u32 %v2009_v6, %v1660_v32 }
  0xdf   :  { %1228 = vmatpush.bf16.msra.mxu0 %v1531_v52  ;;  %1242 = vmatpush.bf16.msra.mxu1 %v1659_v9  ;;  %v2017_v52 = vld [vmem:[#allocation8 + $0x1ec] sm:$0xf]  ;;  %v1692_v9 = vld [vmem:[#allocation8 + $0x1f8] sm:$0xf0]  ;;  %v2023_v55 = vld [vmem:[#allocation8 + $0x214] sm:$0xf0]  ;;  %v1579_v57 = vor.u32 %v1991_v50, %v1578_v48 }
  0xe0   :  { %v1707_v22 = vor.u32 %v2023_v55, %v1706_v33  ;;  %v1916_v39 = vld [vmem:[#allocation8 + $0x3b8] sm:$0xf0]  ;;  %v1973_v42 = vld [vmem:[#allocation8 + $0x8c] sm:$0xf] }
  0xe1   :  { %v1516_v43 = vld [vmem:[#allocation8 + $0x98] sm:$0xf0]  ;;  %v2005_v44 = vld [vmem:[#allocation8 + $0x18c] sm:$0xf] }
  0xe2   :  { %1256 = vmatpush.bf16.msra.mxu2 %v1787_v58  ;;  %1270 = vmatpush.bf16.msra.mxu3 %v1915_v60  ;;  %v1834_v58 = vld [vmem:[#allocation8 + $0x308] sm:$0xf]  ;;  %v2055_v60 = vld [vmem:[#allocation8 + $0x314] sm:$0xf0]  ;;  %v1644_v45 = vld [vmem:[#allocation8 + $0x198] sm:$0xf0]  ;;  %v1519_v10 = vor.u32 %v1973_v42, %v1516_v43 }
  0xe3   :  { %1229 = vmatpush.bf16.msra.mxu0 %v1515_v12  ;;  %1243 = vmatpush.bf16.msra.mxu1 %v1643_v15  ;;  %v1695_v12 = vor.u32 %v2017_v52, %v1692_v9  ;;  %v1820_v15 = vld [vmem:[#allocation8 + $0x2f8] sm:$0xf0]  ;;  %v1835_v46 = vor.u32 %v2055_v60, %v1834_v58  ;;  %v2037_v40 = vld [vmem:[#allocation8 + $0x28c] sm:$0xf]  ;;  %v1647_v34 = vor.u32 %v2005_v44, %v1644_v45 }
  0xe4   :  { %v1900_v47 = vld [vmem:[#allocation8 + $0x398] sm:$0xf0]  ;;  %v1969_v48 = vld [vmem:[#allocation8 + $0x6c] sm:$0xf] }
  0xe5   :  { %1178 = vmatmul.bf16.vlgmr.msrb.gmra.mxu0 %v2565_v30  ;;  %1192 = vmatmul.bf16.vlgmr.msrb.gmra.mxu1 %v2567_v31  ;;  %v1500_v50 = vld [vmem:[#allocation8 + $0x78] sm:$0xf0]  ;;  %v2001_v52 = vld [vmem:[#allocation8 + $0x16c] sm:$0xf] }
  0xe6   :  { %1257 = vmatpush.bf16.msra.mxu2 %v1771_v24  ;;  %1271 = vmatpush.bf16.msra.mxu3 %v1899_v61  ;;  %v1823_v24 = vor.u32 %v2049_v5, %v1820_v15  ;;  %v1951_v61 = vor.u32 %v2081_v20, %v1948_v21  ;;  %v1628_v9 = vld [vmem:[#allocation8 + $0x178] sm:$0xf0]  ;;  %v2065_v33 = vld [vmem:[#allocation8 + $0x36c] sm:$0xf] }
  0xe7   :  { %1230 = vmatpush.bf16.msra.mxu0 %v1499_v27  ;;  %1244 = vmatpush.bf16.msra.mxu1 %v1627_v56  ;;  %v2045_v27 = vld [vmem:[#allocation8 + $0x2cc] sm:$0xf]  ;;  %v1804_v56 = vld [vmem:[#allocation8 + $0x2d8] sm:$0xf0] }
  0xe8   :  { %v1884_v55 = vld [vmem:[#allocation8 + $0x378] sm:$0xf0]  ;;  %v1965_v58 = vld [vmem:[#allocation8 + $0x4c] sm:$0xf] }
  0xe9   :  { %1206 = vmatmul.bf16.vlgmr.msrb.gmra.mxu2 %v2571_v2  ;;  %1220 = vmatmul.bf16.vlgmr.msrb.gmra.mxu3 %v2573_v0  ;;  %v1484_v60 = vld [vmem:[#allocation8 + $0x58] sm:$0xf0]  ;;  %v2029_v20 = vld [vmem:[#allocation8 + $0x24c] sm:$0xf] }
  0xea   :  { %1258 = vmatpush.bf16.msra.mxu2 %v1755_v16  ;;  %1272 = vmatpush.bf16.msra.mxu3 %v1883_v18  ;;  %v1807_v16 = vor.u32 %v2045_v27, %v1804_v56  ;;  %v1935_v18 = vor.u32 %v2077_v28, %v1932_v59  ;;  %v1612_v15 = vld [vmem:[#allocation8 + $0x158] sm:$0xf0]  ;;  %v1487_v23 = vor.u32 %v1965_v58, %v1484_v60  ;;  %v1993_v27 = vld [vmem:[#allocation8 + $0x12c] sm:$0xf] }
  0xeb   :  { %1231 = vmatpush.bf16.msra.mxu0 %v1483_v17  ;;  %1245 = vmatpush.bf16.msra.mxu1 %v1611_v35  ;;  %v2041_v17 = vld [vmem:[#allocation8 + $0x2ac] sm:$0xf]  ;;  %v1788_v35 = vld [vmem:[#allocation8 + $0x2b8] sm:$0xf0] }
  0xec   :  { %v1740_v21 = vld [vmem:[#allocation8 + $0x258] sm:$0xf0]  ;;  %v2025_v28 = vld [vmem:[#allocation8 + $0x22c] sm:$0xf] }
  0xed   :  { %v1743_v26 = vor.u32 %v2029_v20, %v1740_v21  ;;  %v1596_v56 = vld [vmem:[#allocation8 + $0x138] sm:$0xf0] }
  0xee   :  { %1259 = vmatpush.bf16.msra.mxu2 %v1739_v49  ;;  %1273 = vmatpush.bf16.msra.mxu3 %v1867_v1  ;;  %v1791_v49 = vor.u32 %v2041_v17, %v1788_v35  ;;  %v1919_v1 = vor.u32 %v2073_v38, %v1916_v39  ;;  %v1724_v59 = vld [vmem:[#allocation8 + $0x238] sm:$0xf0]  ;;  %v1599_v29 = vor.u32 %v1993_v27, %v1596_v56  ;;  %v1989_v17 = vld [vmem:[#allocation8 + $0x10c] sm:$0xf] }
  0xef   :  { %1232 = vmatpush.bf16.msra.mxu0 %v1467_v8  ;;  %1246 = vmatpush.bf16.msra.mxu1 %v1595_v3  ;;  %v1772_v8 = vld [vmem:[#allocation8 + $0x298] sm:$0xf0]  ;;  %v2069_v3 = vld [vmem:[#allocation8 + $0x38c] sm:$0xf]  ;;  %v1727_v6 = vor.u32 %v2025_v28, %v1724_v59 }
  0xf0   :  { %v1775_v51 = vor.u32 %v2037_v40, %v1772_v8  ;;  %v1903_v36 = vor.u32 %v2069_v3, %v1900_v47  ;;  %v1580_v35 = vld [vmem:[#allocation8 + $0x118] sm:$0xf0]  ;;  %v2021_v38 = vld [vmem:[#allocation8 + $0x20c] sm:$0xf] }
  0xf1   :  { %v1708_v39 = vld [vmem:[#allocation8 + $0x218] sm:$0xf0]  ;;  %v1583_v43 = vor.u32 %v1989_v17, %v1580_v35 }
  0xf2   :  { %1260 = vmatpush.bf16.msra.mxu2 %v1723_v53  ;;  %1274 = vmatpush.bf16.msra.mxu3 %v1851_v54  ;;  %v2033_v53 = vld [vmem:[#allocation8 + $0x26c] sm:$0xf]  ;;  %v1756_v54 = vld [vmem:[#allocation8 + $0x278] sm:$0xf0] }
  0xf3   :  { %1233 = vmatpush.bf16.msra.mxu0 %v1451_v11  ;;  %1247 = vmatpush.bf16.msra.mxu1 %v1579_v57  ;;  %v1503_v11 = vor.u32 %v1969_v48, %v1500_v50  ;;  %v1631_v57 = vor.u32 %v2001_v52, %v1628_v9  ;;  %v1759_v5 = vor.u32 %v2033_v53, %v1756_v54 }
  0xf6   :  { %1261 = vmatpush.bf16.msra.mxu2 %v1707_v22  ;;  %1275 = vmatpush.bf16.msra.mxu3 %v1835_v46  ;;  %v2061_v22 = vld [vmem:[#allocation8 + $0x34c] sm:$0xf]  ;;  %v1868_v46 = vld [vmem:[#allocation8 + $0x358] sm:$0xf0] }
  0xf7   :  { %1282 = vmatpush.bf16.msrb.mxu0 %v1567_v14  ;;  %1296 = vmatpush.bf16.msrb.mxu1 %v1695_v12  ;;  %v1887_v14 = vor.u32 %v2065_v33, %v1884_v55  ;;  %v1997_v12 = vld [vmem:[#allocation8 + $0x14c] sm:$0xf]  ;;  %v1871_v62 = vor.u32 %v2061_v22, %v1868_v46 }
  0xf8   :  { %1234 = vmatmul.bf16.vlgmr.msra.gmra.mxu0 %v2565_v30  ;;  %1248 = vmatmul.bf16.vlgmr.msra.gmra.mxu1 %v2567_v31  ;;  %v1615_v13 = vor.u32 %v1997_v12, %v1612_v15 }
  0xf9   :  { %1262 = vmatmul.bf16.vlgmr.msra.gmra.mxu2 %v2571_v2  ;;  %1276 = vmatmul.bf16.vlgmr.msra.gmra.mxu3 %v2573_v0 }
  0xfa   :  { %1310 = vmatpush.bf16.msrb.mxu2 %v1823_v24  ;;  %1324 = vmatpush.bf16.msrb.mxu3 %v1951_v61  ;;  %v1961_v24 = vld [vmem:[#allocation8 + $0x2c] sm:$0xf]  ;;  %v1468_v61 = vld [vmem:[#allocation8 + $0x38] sm:$0xf0] }
  0xfb   :  { %1283 = vmatpush.bf16.msrb.mxu0 %v1551_v63  ;;  %1297 = vmatpush.bf16.msrb.mxu1 %v1679_v7  ;;  %v2057_v63 = vld [vmem:[#allocation8 + $0x32c] sm:$0xf]  ;;  %v1852_v7 = vld [vmem:[#allocation8 + $0x338] sm:$0xf0]  ;;  %v1471_v25 = vor.u32 %v1961_v24, %v1468_v61  ;;  %v2305_v24 = vmov 0  }
  0xfc   :  { %v1855_v32 = vor.u32 %v2057_v63, %v1852_v7  ;;  %2176 = vset.pattern.permute.xlu1 %v2305_v24  ;;  %2174 = vset.pattern.permute.xlu2 %v2305_v24 }
  0xfd   :  { %2175 = vset.pattern.permute.xlu0 %v2305_v24 }
  0xfe   :  { %1311 = vmatpush.bf16.msrb.mxu2 %v1807_v16  ;;  %1325 = vmatpush.bf16.msrb.mxu3 %v1935_v18  ;;  %v1957_v16 = vld [vmem:[#allocation8 + $0xc] sm:$0xf]  ;;  %v1452_v18 = vld [vmem:[#allocation8 + $0x18] sm:$0xf0] }
  0xff   :  { %1284 = vmatpush.bf16.msrb.mxu0 %v1535_v4  ;;  %1298 = vmatpush.bf16.msrb.mxu1 %v1663_v41  ;;  %v2053_v4 = vld [vmem:[#allocation8 + $0x30c] sm:$0xf]  ;;  %v1836_v41 = vld [vmem:[#allocation8 + $0x318] sm:$0xf0]  ;;  %v1455_v42 = vor.u32 %v1957_v16, %v1452_v18 }
 0x102   :  { %1312 = vmatpush.bf16.msrb.mxu2 %v1791_v49  ;;  %1326 = vmatpush.bf16.msrb.mxu3 %v1919_v1  ;;  %v1711_v49 = vor.u32 %v2021_v38, %v1708_v39  ;;  %v1839_v1 = vor.u32 %v2053_v4, %v1836_v41 }
 0x103   :  { %1285 = vmatpush.bf16.msrb.mxu0 %v1519_v10  ;;  %1299 = vmatpush.bf16.msrb.mxu1 %v1647_v34 }
 0x106   :  { %1313 = vmatpush.bf16.msrb.mxu2 %v1775_v51  ;;  %1327 = vmatpush.bf16.msrb.mxu3 %v1903_v36 }
 0x107   :  { %1286 = vmatpush.bf16.msrb.mxu0 %v1503_v11  ;;  %1300 = vmatpush.bf16.msrb.mxu1 %v1631_v57 }
 0x10a   :  { %1314 = vmatpush.bf16.msrb.mxu2 %v1759_v5  ;;  %1328 = vmatpush.bf16.msrb.mxu3 %v1887_v14 }
 0x10b   :  { %1287 = vmatpush.bf16.msrb.mxu0 %v1487_v23  ;;  %1301 = vmatpush.bf16.msrb.mxu1 %v1615_v13 }
 0x10e   :  { %1315 = vmatpush.bf16.msrb.mxu2 %v1743_v26  ;;  %1329 = vmatpush.bf16.msrb.mxu3 %v1871_v62 }
 0x10f   :  { %1288 = vmatpush.bf16.msrb.mxu0 %v1471_v25  ;;  %1302 = vmatpush.bf16.msrb.mxu1 %v1599_v29 }
 0x112   :  { %1316 = vmatpush.bf16.msrb.mxu2 %v1727_v6  ;;  %1330 = vmatpush.bf16.msrb.mxu3 %v1855_v32 }
 0x113   :  { %1289 = vmatpush.bf16.msrb.mxu0 %v1455_v42  ;;  %1303 = vmatpush.bf16.msrb.mxu1 %v1583_v43 }
 0x116   :  { %1317 = vmatpush.bf16.msrb.mxu2 %v1711_v49  ;;  %1331 = vmatpush.bf16.msrb.mxu3 %v1839_v1 }
 0x117   :  { %1290 = vmatmul.bf16.vlgmr.msrb.gmra.mxu0 %v2565_v30  ;;  %1304 = vmatmul.bf16.vlgmr.msrb.gmra.mxu1 %v2567_v31 }
 0x119   :  { %1318 = vmatmul.bf16.vlgmr.msrb.gmra.mxu2 %v2571_v2  ;;  %1332 = vmatmul.bf16.vlgmr.msrb.gmra.mxu3 %v2573_v0 }
 0x121   :  { %v2590_v53 = vpop.xlane.xlu1 %88 }
 0x122   :  { %vm109_vm15 = vcmp.eq.f32.partialorder %v2590_v53, inf  ;;  %vm111_vm1 = vcmp.eq.f32.partialorder %v2590_v53, 0.0 }
 0x130   :  { %v249_v44 = vpop.xlane.xlu2 %248 }
 0x131   :  { %2183 = vrsqrt.f32 %v249_v44  ;;  %vm262_vm3 = vcmp.eq.f32.partialorder %v249_v44, inf  ;;  %v265_v30 = vand.u32 2147483648, %v249_v44  ;;  %vm264_vm4 = vcmp.eq.f32.partialorder %v249_v44, 0.0 }
 0x137   :  { %v2184_v45 = vpop.eup %2183 }
 0x138   :  { %v256_v40 = vmul.f32 %v2184_v45, %v249_v44  ;;  %v84_v8 = vpop.xlane.xlu0 %83 }
 0x139   :  { %2185 = vrsqrt.f32 %v84_v8  ;;  %vm97_vm5 = vcmp.eq.f32.partialorder %v84_v8, inf  ;;  %vm99_vm7 = vcmp.eq.f32.partialorder %v84_v8, 0.0  ;;  %v100_v13 = vand.u32 2147483648, %v84_v8 }
 0x13a   :  { %v257_v3 = vmul.f32 %v2184_v45, %v256_v40  ;;  %v112_v40 = vand.u32 2147483648, %v2590_v53 }
 0x13c   :  { %v258_v47 = vmul.f32 0.5, %v257_v3 }
 0x13e   :  { %v259_v10 = vsub.f32 1.5, %v258_v47 }
 0x13f   :  { %v2186_v34 = vpop.eup %2185 }
 0x140   :  { %v260_v48 = vmul.f32 %v2184_v45, %v259_v10  ;;  %v91_v50 = vmul.f32 %v2186_v34, %v84_v8 }
 0x142   :  { %v261_v51 = vmul.f32 %v260_v48, %v249_v44  ;;  %v92_v31 = vmul.f32 %v2186_v34, %v91_v50 }
 0x144   :  { %v263_v36 = vsel %vm262_vm3, %v249_v44, %v261_v51  ;;  %v254_v0 = vpop.xlane.xlu2 %253  ;;  %v93_v52 = vmul.f32 0.5, %v92_v31 }
 0x145   :  { %v266_v2 = vsel %vm264_vm4, %v265_v30, %v263_v36  ;;  %2187 = vrsqrt.f32 %v254_v0  ;;  %vm274_vm11 = vcmp.eq.f32.partialorder %v254_v0, inf  ;;  %v277_v63 = vand.u32 2147483648, %v254_v0 }
 0x146   :  { %v279_v9 = vmul.f32 %v266_v2, %v2386_v37  ;;  %v94_v54 = vsub.f32 1.5, %v93_v52  ;;  %vm276_vm12 = vcmp.eq.f32.partialorder %v254_v0, 0.0 }
 0x148   :  { %2189 = vrcp.f32 %v279_v9  ;;  %v95_v11 = vmul.f32 %v2186_v34, %v94_v54  ;;  %v292_v21 = vand.u32 2147483647, %v279_v9  ;;  %v294_v22 = vand.u32 2147483648, %v279_v9 }
 0x149   :  { %2191 = vrsqrt.f32 %v2590_v53  ;;  %vm288_vm8 = vweird.f32 %v279_v9  ;;  %vm281_vm14 = vcmp.gt.f32.partialorder %v279_v9, 0.0 }
 0x14a   :  { %v96_v15 = vmul.f32 %v95_v11, %v84_v8  ;;  %v295_v56 = vor.u32 1.1754944e-38, %v294_v22  ;;  %vm293_vm10 = vcmp.eq.f32.partialorder %v292_v21, 8.507059e+37 }
 0x14b   :  { %v2188_v33 = vpop.eup %2187 }
 0x14c   :  { %v268_v55 = vmul.f32 %v2188_v33, %v254_v0  ;;  %v98_v62 = vsel %vm97_vm5, %v84_v8, %v96_v15 }
 0x14d   :  { %v101_v25 = vsel %vm99_vm7, %v100_v13, %v98_v62 }
 0x14e   :  { %v2190_v57 = vpop.eup %2189  ;;  %v269_v60 = vmul.f32 %v2188_v33, %v268_v55 }
 0x14f   :  { %v2192_v58 = vpop.eup %2191  ;;  %v284_v5 = vmul.f32 %v2190_v57, %v279_v9  ;;  %vm289_vm6 = vweird.f32 %v2190_v57 }
 0x150   :  { %v270_v14 = vmul.f32 0.5, %v269_v60  ;;  %v103_v20 = vmul.f32 %v2192_v58, %v2590_v53  ;;  %vm290_vm9 = vmor %vm288_vm8, %vm289_vm6 }
 0x151   :  { %v285_v12 = vsub.f32 1.0, %v284_v5 }
 0x152   :  { %v271_v46 = vsub.f32 1.5, %v270_v14  ;;  %v104_v27 = vmul.f32 %v2192_v58, %v103_v20  ;;  %v1123_v2 = vpop.f32.mrf.mxu0 }
 0x153   :  { %v286_v23 = vmul.f32 %v2190_v57, %v285_v12 }
 0x154   :  { %v272_v61 = vmul.f32 %v2188_v33, %v271_v46  ;;  %v105_v18 = vmul.f32 0.5, %v104_v27 }
 0x155   :  { %v287_v26 = vadd.f32 %v2190_v57, %v286_v23 }
 0x156   :  { %v273_v28 = vmul.f32 %v272_v61, %v254_v0  ;;  %v106_v38 = vsub.f32 1.5, %v105_v18 }
 0x157   :  { %v291_v59 = vsel %vm290_vm9, %v2190_v57, %v287_v26 }
 0x158   :  { %v296_v7 = vsel %vm293_vm10, %v295_v56, %v291_v59  ;;  %v275_v29 = vsel %vm274_vm11, %v254_v0, %v273_v28  ;;  %v107_v39 = vmul.f32 %v2192_v58, %v106_v38  ;;  %v1137_v0 = vpop.f32.mrf.mxu1 }
 0x159   :  { %v311_v16 = vmul.f32 %v296_v7, %v101_v25  ;;  %v278_v6 = vsel %vm276_vm12, %v277_v63, %v275_v29  ;;  %v1138_v62 = vadd.f32 %v1137_v0, %v1123_v2 }
 0x15a   :  { %v280_v32 = vmul.f32 %v278_v6, %v2393_v19  ;;  %v108_v49 = vmul.f32 %v107_v39, %v2590_v53 }
 0x15b   :  { %v313_v17 = vsel %vm281_vm14, %v311_v16, 1.0  ;;  %v1358_v16 = vld [vmem:[#allocation10] sm:$0xf] }
 0x15c   :  { %v315_v35 = vmul.f32 %v313_v17, %v2386_v37  ;;  %320 = vst.msk [vmem:[#allocation4] sm:$0xff] %vm317_vm13, %v313_v17  ;;  %2193 = vrcp.f32 %v280_v32  ;;  %v308_v44 = vand.u32 2147483648, %v280_v32  ;;  %v306_v45 = vand.u32 2147483647, %v280_v32  ;;  %v1151_v52 = vpop.f32.mrf.mxu2  ;;  %v1165_v9 = vpop.f32.mrf.mxu3 }
 0x15d   :  { %v110_v8 = vsel %vm109_vm15, %v2590_v53, %v108_v49  ;;  %vm302_vm2 = vweird.f32 %v280_v32  ;;  %vm282_vm5 = vcmp.gt.f32.partialorder %v280_v32, 0.0  ;;  %v1125_v53 = vpop.f32.mrf.mxu0  ;;  %v1152_v59 = vadd.f32 %v1151_v52, %v1138_v62 }
 0x15e   :  { %318 = vst.msk [vmem:[#allocation3] sm:$0xff] %vm317_vm13, %v315_v35  ;;  %v309_v47 = vor.u32 1.1754944e-38, %v308_v44  ;;  %vm307_vm4 = vcmp.eq.f32.partialorder %v306_v45, 8.507059e+37  ;;  %v113_v34 = vsel %vm111_vm1, %v112_v40, %v110_v8  ;;  %v1362_v38 = vperm.slane %v1358_v16, 0 }
 0x15f   :  { %v1166_v6 = vadd.f32 %v1165_v9, %v1152_v59  ;;  %v1363_v39 = vperm.slane %v1358_v16, 1 }
 0x160   :  { %v1139_v54 = vpop.f32.mrf.mxu1 }
 0x162   :  { %v2194_v4 = vpop.eup %2193 }
 0x163   :  { %v1359_v41 = vld [vmem:[#allocation4] sm:$0xff]  ;;  %v298_v42 = vmul.f32 %v2194_v4, %v280_v32  ;;  %vm303_vm0 = vweird.f32 %v2194_v4 }
 0x164   :  { %1372 = vperm.xlu1 %2176, %v1359_v41   ;;  %vm304_vm3 = vmor %vm302_vm2, %vm303_vm0  ;;  %v2607_v33 = vpop.f32.mrf.mxu2  ;;  %v2609_v55 = vpop.f32.mrf.mxu3  ;;  %v1365_v41 = vperm.slane %v1358_v16, 3 }
 0x165   :  { %v1338_v43 = vld [vmem:[#allocation3] sm:$0xff]  ;;  %v299_v1 = vsub.f32 1.0, %v298_v42  ;;  %v1179_v11 = vpop.f32.mrf.mxu0 }
 0x166   :  { %1342 = vperm.xlu2 %2174, %v1338_v43  }
 0x167   :  { %v300_v37 = vmul.f32 %v2194_v4, %v299_v1 }
 0x169   :  { %v301_v3 = vadd.f32 %v2194_v4, %v300_v37 }
 0x16b   :  { %v305_v10 = vsel %vm304_vm3, %v2194_v4, %v301_v3  ;;  %v1364_v4 = vperm.slane %v1358_v16, 2 }
 0x16c   :  { %v310_v48 = vsel %vm307_vm4, %v309_v47, %v305_v10  ;;  %v1207_v57 = vpop.f32.mrf.mxu2  ;;  %v1221_v58 = vpop.f32.mrf.mxu3 }
 0x16d   :  { %v312_v50 = vmul.f32 %v310_v48, %v113_v34  ;;  %v1181_v60 = vpop.f32.mrf.mxu0 }
 0x16f   :  { %v314_v51 = vsel %vm282_vm5, %v312_v50, 1.0 }
 0x170   :  { %v316_v30 = vmul.f32 %v314_v51, %v2393_v19  ;;  %321 = vst.msk [vmem:[#allocation4 + $0x8] sm:$0xff] %vm317_vm13, %v314_v51  ;;  %v1193_v19 = vpop.f32.mrf.mxu1 }
 0x171   :  { %v1194_v27 = vadd.f32 %v1193_v19, %v1179_v11 }
 0x172   :  { %319 = vst.msk [vmem:[#allocation3 + $0x8] sm:$0xff] %vm317_vm13, %v316_v30 }
 0x173   :  { %v1208_v63 = vadd.f32 %v1207_v57, %v1194_v27 }
 0x174   :  { %v1209_v14 = vpop.f32.mrf.mxu2  ;;  %v1223_v12 = vpop.f32.mrf.mxu3 }
 0x175   :  { %v1235_v15 = vpop.f32.mrf.mxu0  ;;  %v1222_v32 = vadd.f32 %v1221_v58, %v1208_v63 }
 0x177   :  { %v1360_v31 = vld [vmem:[#allocation4 + $0x8] sm:$0xff] }
 0x178   :  { %1377 = vperm.xlu2 %2174, %v1360_v31   ;;  %v1195_v5 = vpop.f32.mrf.mxu1  ;;  %v1140_v31 = vadd.f32 %v1139_v54, %v1125_v53 }
 0x179   :  { %v1339_v36 = vld [vmem:[#allocation3 + $0x8] sm:$0xff] }
 0x17a   :  { %1347 = vperm.xlu0 %2175, %v1339_v36   ;;  %v1196_v36 = vadd.f32 %v1195_v5, %v1181_v60  ;;  %v1154_v52 = vadd.f32 %v2607_v33, %v1140_v31 }
 0x17c   :  { %v1263_v21 = vpop.f32.mrf.mxu2  ;;  %v1277_v22 = vpop.f32.mrf.mxu3  ;;  %v1210_v9 = vadd.f32 %v1209_v14, %v1196_v36 }
 0x17d   :  { %v1237_v46 = vpop.f32.mrf.mxu0 }
 0x180   :  { %v1249_v20 = vpop.f32.mrf.mxu1 }
 0x181   :  { %v1250_v56 = vadd.f32 %v1249_v20, %v1235_v15  ;;  %v1168_v15 = vadd.f32 %v2609_v55, %v1154_v52  ;;  %v1224_v20 = vadd.f32 %v1223_v12, %v1210_v9 }
 0x183   :  { %v1264_v7 = vadd.f32 %v1263_v21, %v1250_v56 }
 0x184   :  { %v1265_v13 = vpop.f32.mrf.mxu2  ;;  %v1279_v24 = vpop.f32.mrf.mxu3 }
 0x185   :  { %v1278_v17 = vadd.f32 %v1277_v22, %v1264_v7 }
 0x188   :  { %v1251_v23 = vpop.f32.mrf.mxu1 }
 0x189   :  { %v1252_v2 = vadd.f32 %v1251_v23, %v1237_v46 }
 0x18b   :  { %v1266_v11 = vadd.f32 %v1265_v13, %v1252_v2 }
 0x18d   :  { %v1280_v21 = vadd.f32 %v1279_v24, %v1266_v11 }
 0x194   :  { %v1291_v61 = vpop.f32.mrf.mxu0  ;;  %v1305_v26 = vpop.f32.mrf.mxu1 }
 0x195   :  { %v1306_v25 = vadd.f32 %v1305_v26, %v1291_v61 }
 0x19c   :  { %v1319_v28 = vpop.f32.mrf.mxu2  ;;  %v1333_v35 = vpop.f32.mrf.mxu3 }
 0x19d   :  { %v1320_v29 = vadd.f32 %v1319_v28, %v1306_v25  ;;  %v1293_v50 = vpop.f32.mrf.mxu0  ;;  %v1307_v51 = vpop.f32.mrf.mxu1 }
 0x19e   :  { %v1308_v0 = vadd.f32 %v1307_v51, %v1293_v50 }
 0x19f   :  { %v1334_v42 = vadd.f32 %v1333_v35, %v1320_v29 }
 0x1a4   :  { %v1321_v30 = vpop.f32.mrf.mxu2  ;;  %v1335_v58 = vpop.f32.mrf.mxu3 }
 0x1a5   :  { %v1322_v19 = vadd.f32 %v1321_v30, %v1308_v0 }
 0x1a7   :  { %v1336_v22 = vadd.f32 %v1335_v58, %v1322_v19 }
 0x1c0   :  { %v1343_v18 = vpop.permute.xlu2 %1342 }
 0x1c1   :  { %v1350_v43 = vmul.f32 %v1343_v18, %v1166_v6  ;;  %v1351_v49 = vmul.f32 %v1343_v18, %v1222_v32  ;;  %v1352_v1 = vmul.f32 %v1343_v18, %v1278_v17  ;;  %v1353_v3 = vmul.f32 %v1343_v18, %v1334_v42 }
 0x1d2   :  { %v1378_v57 = vpop.permute.xlu2 %1377 }
 0x1d3   :  { %v1384_v61 = vmul.f32 %v1378_v57, %v1362_v38  ;;  %v1385_v26 = vmul.f32 %v1378_v57, %v1363_v39  ;;  %v1386_v62 = vmul.f32 %v1378_v57, %v1364_v4  ;;  %v1387_v46 = vmul.f32 %v1378_v57, %v1365_v41 }
 0x1d6   :  { %v1373_v44 = vpop.permute.xlu1 %1372 }
 0x1d7   :  { %v1380_v37 = vmul.f32 %v1373_v44, %v1362_v38  ;;  %v1381_v45 = vmul.f32 %v1373_v44, %v1363_v39  ;;  %v1382_v40 = vmul.f32 %v1373_v44, %v1364_v4  ;;  %v1383_v8 = vmul.f32 %v1373_v44, %v1365_v41 }
 0x1d9   :  { %v1388_v47 = vadd.f32 %v1380_v37, %v1350_v43  ;;  %v1389_v10 = vadd.f32 %v1381_v45, %v1351_v49  ;;  %v1390_v34 = vadd.f32 %v1382_v40, %v1352_v1  ;;  %v1391_v48 = vadd.f32 %v1383_v8, %v1353_v3 }
 0x1db   :  { %1396 = vst [vmem:[#allocation11] sm:$0xff] %v1388_v47 }
 0x1dc   :  { %1397 = vst [vmem:[#allocation11 + $0x8] sm:$0xff] %v1389_v10 }
 0x1dd   :  { %1398 = vst [vmem:[#allocation11 + $0x10] sm:$0xff] %v1390_v34 }
 0x1de   :  { %1399 = vst [vmem:[#allocation11 + $0x18] sm:$0xff] %v1391_v48 }
 0x1ec   :  { %v1348_v27 = vpop.permute.xlu0 %1347 }
 0x1ed   :  { %v1354_v53 = vmul.f32 %v1348_v27, %v1168_v15  ;;  %v1355_v54 = vmul.f32 %v1348_v27, %v1224_v20  ;;  %v1356_v60 = vmul.f32 %v1348_v27, %v1280_v21  ;;  %v1357_v5 = vmul.f32 %v1348_v27, %v1336_v22 }
 0x1ef   :  { %v1392_v33 = vadd.f32 %v1384_v61, %v1354_v53  ;;  %v1393_v14 = vadd.f32 %v1385_v26, %v1355_v54  ;;  %v1394_v23 = vadd.f32 %v1386_v62, %v1356_v60  ;;  %v1395_v55 = vadd.f32 %v1387_v46, %v1357_v5 }
 0x1f1   :  { %1400 = vst [vmem:[#allocation11 + $0x20] sm:$0xff] %v1392_v33 }
 0x1f2   :  { %1401 = vst [vmem:[#allocation11 + $0x28] sm:$0xff] %v1393_v14 }
 0x1f3   :  { %1402 = vst [vmem:[#allocation11 + $0x30] sm:$0xff] %v1394_v23 }
 0x1f4   :  { %1403 = vst [vmem:[#allocation11 + $0x38] sm:$0xff] %v1395_v55 }
 0x1f5   :  { %1416 = dma.vmem_to_hbm [thread:$0]  %s1409_s29, 1024, %s1411_s5, [#allocation7], %s2301_s24, %s2301_s24, %s2302_s25  }
 0x1f6   :  { %2295 = dma.done.wait [#allocation7], 1024  }
 0x1f7   :  { %2296 = vsyncadd [#allocation7], 4294966272 }
 0x1f8   :  { %1421 = vsyncpa [#allocation6], 1 }
 0x1f9   :  { %1422 = vsyncpa [#allocation9], 1 }
 0x1fa   :  { %1423 = vsyncpa [#allocation7], 1 }

</bundles_post_ra>
